<compile_context>
chip_gen: v7x
topology: tpu7x:2x2x1
jax: 0.10.0
libtpu: 0.0.40
codegen_flags: <defaults>
</compile_context>

<pallas_src>
import functools
import math

import jax
import jax.numpy as jnp
from jax import lax
from jax.experimental import pallas as pl
from jax.experimental.pallas import tpu as pltpu

_MATMUL_DTYPE = jnp.bfloat16     # MXU operand dtype
_STORE_DTYPE = jnp.bfloat16      # dtype of the x1 / x2 intermediates in HBM


def _silu(y, approx=True):
    # y * sigmoid(y); exp (and the approx reciprocal) run on the EUP slot.
    return y * pl.reciprocal(1.0 + jnp.exp(-y), approx=approx)


# --------------------------- sizing helpers ----------------------------------

def _ceil_to(x, m):
    return -(-x // m) * m


def _block_vmem_bytes(shape, dtype):
    """Rough VMEM footprint of one block (last dim -> 128 lanes, 2nd-last -> 8)."""
    s = list(shape)
    if len(s) >= 1:
        s[-1] = _ceil_to(s[-1], 128)
    if len(s) >= 2:
        s[-2] = _ceil_to(s[-2], 8)
    n = 1
    for d in s:
        n *= int(d)
    return n * jnp.dtype(dtype).itemsize


def _vmem_limit_bytes():
    """Per-generation scoped-VMEM budget (~45% of physical capacity)."""
    try:
        cap = int(pltpu.get_tpu_info().vmem_capacity_bytes)
    except Exception:
        cap = 0
    if cap <= 0:
        cap = 64 << 20            # conservative fallback (v7x per-TC VMEM)
    # ~28 MiB on v7x (64 MiB/TC), ~57 MiB on v5e/v6e (128 MiB).
    return int(min(96 << 20, max(16 << 20, (cap * 45) // 100)))


def _pick_tile(n, bytes_per_unit, budget_bytes, min_steps=1):
    """Largest divisor of n that fits the budget (and gives >= min_steps steps)."""
    cap = max(1, budget_bytes // max(1, bytes_per_unit))
    if min_steps > 1 and n >= min_steps:
        cap = min(cap, n // min_steps)
    cap = max(1, min(cap, n))
    best = 1
    for d in range(1, math.isqrt(n) + 1):
        if n % d == 0:
            for cand in (d, n // d):
                if cand <= cap:
                    best = max(best, cand)
    return best


# --------------------- kernel A: maxpool+cv1 and cv2 (1x1) -------------------
# Input is parity-plane-major:  x[p, r, wo, c] == x_img[2*ho+hp, 2*wo+wp, c]
# with p = 2*hp + wp and r = n*Ho + ho.  The 2x2 pool is a max over the plane
# axis; cv2 is ONE matmul over all four planes; the four cv2 plane results are
# stored as a single lane-dense (tr, Wo, 4*c2) bf16 block.

def _pool_cv1_cv2_kernel(x_ref, w1_ref, b1_ref, w2_ref, b2_ref, x1_ref, x2_ref):
    xb = x_ref[...]                                  # (4, tr, Wo, c1) f32
    _, tr, wo, c1 = xb.shape
    c2 = w1_ref.shape[1]

    # ---- branch 2: cv2 1x1 conv, ONE batched matmul over all four planes ----
    xall = xb.reshape(4 * tr * wo, c1).astype(_MATMUL_DTYPE)
    y2 = jnp.dot(xall, w2_ref[...], preferred_element_type=jnp.float32)
    # exact reciprocal here: this activation is amplified through cv3's taps.
    y2 = _silu(y2 + b2_ref[...], approx=False)
    y2 = y2.astype(x2_ref.dtype).reshape(4, tr, wo, c2)
    # merged x2 planes, channel order [ee, eo, oe, oo] -> one lane-dense store.
    x2_ref[...] = jnp.concatenate([y2[0], y2[1], y2[2], y2[3]], axis=-1)

    # ---- branch 1: 2x2 max pool + 1x1 conv (BN scale folded in w1) ----------
    m = jnp.max(xb, axis=0)                          # (tr, Wo, c1)
    y1 = jnp.dot(m.reshape(tr * wo, c1).astype(_MATMUL_DTYPE), w1_ref[...],
                 preferred_element_type=jnp.float32)
    y1 = _silu(y1 + b1_ref[...])
    x1_ref[...] = y1.reshape(tr, wo, c2).astype(x1_ref.dtype)


def fused_pool_cv1_cv2(xa, w1, b1, w2, b2):
    _, r_rows, n_wo, c1 = xa.shape
    c2 = w1.shape[1]

    vmem_limit = _vmem_limit_bytes()
    row_bytes = (_block_vmem_bytes((4, 1, n_wo, c1), xa.dtype)
                 + _block_vmem_bytes((1, n_wo, c2), _STORE_DTYPE)
                 + _block_vmem_bytes((1, n_wo, 4 * c2), _STORE_DTYPE))
    # /5: double-buffered in/out streams plus in-kernel temporaries headroom.
    tr = _pick_tile(r_rows, row_bytes, vmem_limit // 5,
                    min_steps=2 if r_rows >= 2 else 1)
    grid = (r_rows // tr,)

    in_specs = [
        pl.BlockSpec((4, tr, n_wo, c1), lambda i: (0, i, 0, 0)),
        pl.BlockSpec((c1, c2), lambda i: (0, 0)),
        pl.BlockSpec((1, c2), lambda i: (0, 0)),
        pl.BlockSpec((c1, c2), lambda i: (0, 0)),
        pl.BlockSpec((1, c2), lambda i: (0, 0)),
    ]
    out_specs = (
        pl.BlockSpec((tr, n_wo, c2), lambda i: (i, 0, 0)),
        pl.BlockSpec((tr, n_wo, 4 * c2), lambda i: (i, 0, 0)),
    )
    out_shape = (
        jax.ShapeDtypeStruct((r_rows, n_wo, c2), _STORE_DTYPE),       # x1
        jax.ShapeDtypeStruct((r_rows, n_wo, 4 * c2), _STORE_DTYPE),   # merged x2
    )

    n_pix = r_rows * n_wo
    bpe = jnp.dtype(_STORE_DTYPE).itemsize
    cost = pl.CostEstimate(
        flops=int(2 * 5 * n_pix * c1 * c2),
        transcendentals=int(5 * n_pix * c2),
        bytes_accessed=int(xa.size * xa.dtype.itemsize
                           + n_pix * 5 * c2 * bpe
                           + 2 * c1 * c2 * 2 + 2 * c2 * 4),
    )

    return pl.pallas_call(
        _pool_cv1_cv2_kernel,
        grid=grid,
        in_specs=in_specs,
        out_specs=out_specs,
        out_shape=out_shape,
        compiler_params=pltpu.CompilerParams(
            dimension_semantics=("parallel",),
            vmem_limit_bytes=vmem_limit),
        cost_estimate=cost,
    )(xa, w1, b1, w2, b2)


# ------------- kernel B: cv3 (3x3, stride 2, pad 1) + fused concat -----------
# x2 arrives merged as (N, Ho, Wo, 4*c2) bf16 with lanes [ee,eo,oe,oo], so the
# four unshifted center taps of the stride-2 3x3 conv are one K=4*c2 matmul,
# the two row-shifted taps one K=2*c2 matmul and the three col-shifted taps one
# K=3*c2 matmul.  The row shift at a tile boundary uses a 1-row halo block.

def _cv3_concat_kernel(x2_ref, xp_ref, x1_ref, w3c_ref, w3u_ref, w3l_ref,
                       b3_ref, o_ref):
    j = pl.program_id(1)
    x2 = x2_ref[0]                                   # (tho, Wo, 4*c2) bf16
    tho, wo, c4 = x2.shape
    c2 = c4 // 4

    # previous merged row (odd-row planes feed the ky==0 taps); zero at the top
    # of the image (conv padding).
    prev = xp_ref[0]                                 # (1, Wo, 4*c2) bf16
    prev = jnp.where(j > 0, prev, jnp.zeros_like(prev))
    if tho > 1:
        x2_up = jnp.concatenate([prev, x2[:-1]], axis=0)   # rows shifted down 1
    else:
        x2_up = prev

    def shift_w(a):  # out[:, wo] = a[:, wo-1]; zero col at wo == 0 (left pad)
        return jnp.concatenate([jnp.zeros_like(a[:, :1]), a[:, :-1]], axis=1)

    m = tho * wo
    # center taps (1,1),(1,2),(2,1),(2,2): the merged block itself, K = 4*c2.
    acc = jnp.dot(x2.reshape(m, 4 * c2), w3c_ref[...],
                  preferred_element_type=jnp.float32)
    # row-shifted taps (0,1),(0,2): odd-row planes of the previous merged row.
    acc = acc + jnp.dot(x2_up[..., 2 * c2:].reshape(m, 2 * c2), w3u_ref[...],
                        preferred_element_type=jnp.float32)
    # col-shifted taps (1,0),(2,0),(0,0): [eo_l, oo_l, oo_ul], K = 3*c2.
    left = jnp.concatenate(
        [shift_w(x2[..., c2:2 * c2]),
         shift_w(x2[..., 3 * c2:]),
         shift_w(x2_up[..., 3 * c2:])], axis=-1)
    acc = acc + jnp.dot(left.reshape(m, 3 * c2), w3l_ref[...],
                        preferred_element_type=jnp.float32)

    y3 = _silu(acc + b3_ref[...]).reshape(tho, wo, c2)

    # fused channel concat [cv3(x2), x1] -> lane-dense store of width 2*c2.
    if c2 % 128 == 0:
        # lane-aligned halves: two unmasked stores, no (tho,Wo,2*c2) temp (v5e).
        o_ref[0, :, :, :c2] = y3.astype(o_ref.dtype)
        o_ref[0, :, :, c2:] = x1_ref[0].astype(o_ref.dtype)
    else:
        o_ref[0] = jnp.concatenate(
            [y3.astype(o_ref.dtype), x1_ref[0].astype(o_ref.dtype)], axis=-1)


def fused_cv3_concat(x2m, x1, w3c, w3u, w3l, b3):
    n, n_ho, n_wo, c4 = x2m.shape
    c2 = c4 // 4

    vmem_limit = _vmem_limit_bytes()
    row_bytes = (_block_vmem_bytes((1, 1, n_wo, 4 * c2), x2m.dtype)
                 + _block_vmem_bytes((1, 1, n_wo, c2), x1.dtype)
                 + _block_vmem_bytes((1, 1, n_wo, 2 * c2), jnp.float32)
                 + 3 * _block_vmem_bytes((1, 1, n_wo, 4 * c2), x2m.dtype)  # bf16 taps
                 + _block_vmem_bytes((1, 1, n_wo, c2), jnp.float32))       # f32 acc
    tho = _pick_tile(n_ho, row_bytes, vmem_limit // 4,
                     min_steps=1 if n >= 2 else 2)
    grid = (n, n_ho // tho)

    in_specs = [
        pl.BlockSpec((1, tho, n_wo, 4 * c2), lambda b, j: (b, j, 0, 0)),
        # 1-row halo: last merged row of the previous Ho tile (clamped at the
        # image top; zeroed in-kernel when j == 0).
        pl.BlockSpec((1, 1, n_wo, 4 * c2),
                     lambda b, j: (b, jnp.maximum(j * tho - 1, 0), 0, 0)),
        pl.BlockSpec((1, tho, n_wo, c2), lambda b, j: (b, j, 0, 0)),
        pl.BlockSpec((4 * c2, c2), lambda b, j: (0, 0)),
        pl.BlockSpec((2 * c2, c2), lambda b, j: (0, 0)),
        pl.BlockSpec((3 * c2, c2), lambda b, j: (0, 0)),
        pl.BlockSpec((1, c2), lambda b, j: (0, 0)),
    ]
    out_specs = pl.BlockSpec((1, tho, n_wo, 2 * c2), lambda b, j: (b, j, 0, 0))

    n_pix = n * n_ho * n_wo
    bpe = jnp.dtype(_STORE_DTYPE).itemsize
    cost = pl.CostEstimate(
        flops=int(2 * 9 * n_pix * c2 * c2),
        transcendentals=int(n_pix * c2),
        bytes_accessed=int(n_pix * 4 * c2 * bpe + n_pix * c2 * bpe
                           + n_pix * 2 * c2 * 4 + 9 * c2 * c2 * 2 + c2 * 4),
    )

    return pl.pallas_call(
        _cv3_concat_kernel,
        grid=grid,
        in_specs=in_specs,
        out_specs=out_specs,
        out_shape=jax.ShapeDtypeStruct((n, n_ho, n_wo, 2 * c2), jnp.float32),
        compiler_params=pltpu.CompilerParams(
            dimension_semantics=("parallel", "parallel"),
            vmem_limit_bytes=vmem_limit),
        cost_estimate=cost,
    )(x2m, x2m, x1, w3c, w3u, w3l, b3)


# --------------------------------- forward -----------------------------------

def transition_block_forward(x_nchw, params):
    """x_nchw: (N, c1, H, W) float32  ->  (N, 2*c2, H/2, W/2) float32."""
    n, c1, h, w = x_nchw.shape
    ho, wo = h // 2, w // 2
    c2 = params["w1"].shape[1]

    # NCHW -> parity-plane-major layout with a SINGLE transpose copy (the
    # reshapes around it are bitcasts), i.e. no extra HBM round trip vs. a
    # plain NCHW->NHWC transpose:
    #   xa[2*hp+wp, n*Ho+ho, wo, c] = x[n, c, 2*ho+hp, 2*wo+wp]
    xa = x_nchw.reshape(n, c1, ho, 2, wo, 2)
    xa = jnp.transpose(xa, (3, 5, 0, 2, 4, 1))        # (hp, wp, n, ho, wo, c1)
    xa = xa.reshape(4, n * ho, wo, c1)

    x1_r, x2m = fused_pool_cv1_cv2(
        xa, params["w1"], params["b1"], params["w2"], params["b2"])

    out_nhwc = fused_cv3_concat(
        x2m.reshape(n, ho, wo, 4 * c2), x1_r.reshape(n, ho, wo, c2),
        params["w3c"], params["w3u"], params["w3l"], params["b3"])
    return jnp.transpose(out_nhwc, (0, 3, 1, 2))      # back to NCHW (spec output)


# --------------------------- parameter creation -------------------------------

def _bn_fold(gamma, beta, mean, var, eps=1e-3):
    scale = gamma / jnp.sqrt(var + eps)
    bias = beta - mean * scale
    return scale, bias


def make_params(key, c1, c2):
    ks = jax.random.split(key, 15)
    w1_pt = 0.1 * jax.random.normal(ks[0], (c2, c1, 1, 1), jnp.float32)
    w2_pt = 0.1 * jax.random.normal(ks[1], (c2, c1, 1, 1), jnp.float32)
    w3_pt = 0.1 * jax.random.normal(ks[2], (c2, c2, 3, 3), jnp.float32)

    def bn(k0, k1, k2, k3, c):
        gamma = 1.0 + 0.1 * jax.random.normal(k0, (c,), jnp.float32)
        beta = 0.1 * jax.random.normal(k1, (c,), jnp.float32)
        mean = 0.1 * jax.random.normal(k2, (c,), jnp.float32)
        var = jax.random.uniform(k3, (c,), jnp.float32, minval=0.5, maxval=1.5)
        return _bn_fold(gamma, beta, mean, var, eps=1e-3)   # nn.BatchNorm2d eps

    s1, b1 = bn(ks[3], ks[4], ks[5], ks[6], c2)
    s2, b2 = bn(ks[7], ks[8], ks[9], ks[10], c2)
    s3, b3 = bn(ks[11], ks[12], ks[13], ks[14], c2)

    w1 = w1_pt[:, :, 0, 0].T                          # (c1, c2)
    w2 = w2_pt[:, :, 0, 0].T                          # (c1, c2)
    w3_hwio = jnp.transpose(w3_pt, (2, 3, 1, 0))      # (3, 3, c2_in, c2_out)
    w3f = w3_hwio * s3[None, None, None, :]           # BN scale folded (exact)

    # cv3 weight blocks matching kernel B's merged-plane MXU operands:
    #   center (unshifted) taps  [ee, eo, oe, oo]    = (1,1),(1,2),(2,1),(2,2)
    #   row-shifted taps         [oe_u, oo_u]        = (0,1),(0,2)
    #   col-shifted taps         [eo_l, oo_l, oo_ul] = (1,0),(2,0),(0,0)
    w3c = jnp.concatenate([w3f[1, 1], w3f[1, 2], w3f[2, 1], w3f[2, 2]], axis=0)
    w3u = jnp.concatenate([w3f[0, 1], w3f[0, 2]], axis=0)
    w3l = jnp.concatenate([w3f[1, 0], w3f[2, 0], w3f[0, 0]], axis=0)

    params = {
        "w1": (w1 * s1[None, :]).astype(_MATMUL_DTYPE),
        "b1": b1.reshape(1, c2),
        "w2": (w2 * s2[None, :]).astype(_MATMUL_DTYPE),
        "b2": b2.reshape(1, c2),
        "w3c": w3c.astype(_MATMUL_DTYPE),
        "w3u": w3u.astype(_MATMUL_DTYPE),
        "w3l": w3l.astype(_MATMUL_DTYPE),
        "b3": b3.reshape(1, c2),
    }
    ref_params = {
        "w1": w1, "w2": w2, "w3_hwio": w3_hwio,
        "s1": s1, "b1": b1, "s2": s2, "b2": b2, "s3": s3, "b3": b3,
    }
    return params, ref_params


# --------------------------------- reference ----------------------------------

def reference_forward(x_nchw, rp):
    x = jnp.transpose(x_nchw, (0, 2, 3, 1))
    n, h, w, c1 = x.shape

    def silu(v):
        return v * jax.nn.sigmoid(v)

    mp = x.reshape(n, h // 2, 2, w // 2, 2, c1).max(axis=(2, 4))
    x1 = silu(jnp.einsum("nhwc,cd->nhwd", mp, rp["w1"]) * rp["s1"] + rp["b1"])
    x2 = silu(jnp.einsum("nhwc,cd->nhwd", x, rp["w2"]) * rp["s2"] + rp["b2"])
    y = lax.conv_general_dilated(
        x2, rp["w3_hwio"], window_strides=(2, 2), padding=((1, 1), (1, 1)),
        dimension_numbers=("NHWC", "HWIO", "NHWC"))
    x2 = silu(y * rp["s3"] + rp["b3"])
    out = jnp.concatenate([x2, x1], axis=-1)
    return jnp.transpose(out, (0, 3, 1, 2))


# ----------------------------------- main --------------------------------------

if __name__ == "__main__":
    key = jax.random.PRNGKey(0)
    k_x, k_p = jax.random.split(key)

    N, c1, c2, H, W = 2, 4, 8, 16, 16
    x = jax.random.normal(k_x, (N, c1, H, W), jnp.float32)
    params, ref_params = make_params(k_p, c1, c2)

    fwd = jax.jit(functools.partial(transition_block_forward, params=params))
    out = jax.block_until_ready(fwd(x))

    ref = jax.block_until_ready(reference_forward(x, ref_params))
    assert out.shape == (N, 2 * c2, H // 2, W // 2), out.shape
    err = float(jnp.max(jnp.abs(out - ref)))
    # bf16 MXU operands / bf16 x1+x2 intermediates -> relaxed tolerance vs. the
    # pure-f32 reference.
    assert err < 5e-2, err
    print("KERNEL_OK")
</pallas_src>

<mosaic_0001>
module attributes {stable_mosaic.version = 11 : i64} {
  func.func @_cv3_concat_kernel(%arg0: i32, %arg1: i32, %arg2: memref<1x8x8x32xbf16, #tpu.memory_space<vmem>>, %arg3: memref<1x1x8x32xbf16, #tpu.memory_space<vmem>>, %arg4: memref<1x8x8x8xbf16, #tpu.memory_space<vmem>>, %arg5: memref<32x8xbf16, #tpu.memory_space<vmem>>, %arg6: memref<16x8xbf16, #tpu.memory_space<vmem>>, %arg7: memref<24x8xbf16, #tpu.memory_space<vmem>>, %arg8: memref<1x8xf32, #tpu.memory_space<vmem>>, %arg9: memref<1x8x8x16xf32, #tpu.memory_space<vmem>>) attributes {dimension_semantics = [#tpu.dimension_semantics<parallel>, #tpu.dimension_semantics<parallel>], iteration_bounds = array<i64: 2, 1>, scalar_prefetch = 0 : i64, scratch_operands = 0 : i64, tpu.core_type = #tpu.core_type<tc>, window_params = [{transform_indices = @transform_0, window_bounds = array<i64: 1, 8, 8, 32>}, {transform_indices = @transform_1, window_bounds = array<i64: 1, 1, 8, 32>}, {transform_indices = @transform_2, window_bounds = array<i64: 1, 8, 8, 8>}, {pipeline_mode = #tpu.pipeline_mode<synchronous>, transform_indices = @transform_3, window_bounds = array<i64: 32, 8>}, {pipeline_mode = #tpu.pipeline_mode<synchronous>, transform_indices = @transform_4, window_bounds = array<i64: 16, 8>}, {pipeline_mode = #tpu.pipeline_mode<synchronous>, transform_indices = @transform_5, window_bounds = array<i64: 24, 8>}, {pipeline_mode = #tpu.pipeline_mode<synchronous>, transform_indices = @transform_6, window_bounds = array<i64: 1, 8>}, {transform_indices = @transform_7, window_bounds = array<i64: 1, 8, 8, 16>}]} {
    %c0 = arith.constant 0 : index
    %c0_0 = arith.constant 0 : index
    %c0_1 = arith.constant 0 : index
    %c0_2 = arith.constant 0 : index
    %0 = vector.load %arg2[%c0, %c0_0, %c0_1, %c0_2] : memref<1x8x8x32xbf16, #tpu.memory_space<vmem>>, vector<1x8x8x32xbf16>
    %1 = vector.shape_cast %0 : vector<1x8x8x32xbf16> to vector<8x8x32xbf16>
    %c0_3 = arith.constant 0 : index
    %c0_4 = arith.constant 0 : index
    %c0_5 = arith.constant 0 : index
    %c0_6 = arith.constant 0 : index
    %2 = vector.load %arg3[%c0_3, %c0_4, %c0_5, %c0_6] : memref<1x1x8x32xbf16, #tpu.memory_space<vmem>>, vector<1x1x8x32xbf16>
    %3 = vector.shape_cast %2 : vector<1x1x8x32xbf16> to vector<1x8x32xbf16>
    %c0_i32 = arith.constant 0 : i32
    %4 = arith.cmpi sgt, %arg1, %c0_i32 : i32
    %cst = arith.constant 0.000000e+00 : bf16
    %5 = vector.broadcast %cst : bf16 to vector<1x8x32xbf16>
    %6 = arith.select %4, %3, %5 : vector<1x8x32xbf16>
    %7 = vector.extract_strided_slice %1 {offsets = [0, 0, 0], sizes = [7, 8, 32], strides = [1, 1, 1]} : vector<8x8x32xbf16> to vector<7x8x32xbf16>
    %8 = tpu.concatenate %6, %7 in 0 : vector<1x8x32xbf16>, vector<7x8x32xbf16> -> vector<8x8x32xbf16>
    %9 = vector.shape_cast %1 : vector<8x8x32xbf16> to vector<64x32xbf16>
    %c0_7 = arith.constant 0 : index
    %c0_8 = arith.constant 0 : index
    %10 = vector.load %arg5[%c0_7, %c0_8] : memref<32x8xbf16, #tpu.memory_space<vmem>>, vector<32x8xbf16>
    %cst_9 = arith.constant dense<0.000000e+00> : vector<64x8xf32>
    %11 = tpu.matmul %9, %10, %cst_9 {dimension_numbers = #tpu.dot_dimension_numbers<[1], [0], [0], [1], [0, 0, 1, 1], [], []>} : vector<64x32xbf16>, vector<32x8xbf16>, vector<64x8xf32> -> vector<64x8xf32>
    %12 = vector.extract_strided_slice %8 {offsets = [0, 0, 16], sizes = [8, 8, 16], strides = [1, 1, 1]} : vector<8x8x32xbf16> to vector<8x8x16xbf16>
    %13 = vector.shape_cast %12 : vector<8x8x16xbf16> to vector<64x16xbf16>
    %c0_10 = arith.constant 0 : index
    %c0_11 = arith.constant 0 : index
    %14 = vector.load %arg6[%c0_10, %c0_11] : memref<16x8xbf16, #tpu.memory_space<vmem>>, vector<16x8xbf16>
    %cst_12 = arith.constant dense<0.000000e+00> : vector<64x8xf32>
    %15 = tpu.matmul %13, %14, %cst_12 {dimension_numbers = #tpu.dot_dimension_numbers<[1], [0], [0], [1], [0, 0, 1, 1], [], []>} : vector<64x16xbf16>, vector<16x8xbf16>, vector<64x8xf32> -> vector<64x8xf32>
    %16 = arith.addf %11, %15 : vector<64x8xf32>
    %17 = vector.extract_strided_slice %1 {offsets = [0, 0, 8], sizes = [8, 8, 8], strides = [1, 1, 1]} : vector<8x8x32xbf16> to vector<8x8x8xbf16>
    %cst_13 = arith.constant 0.000000e+00 : bf16
    %18 = vector.broadcast %cst_13 : bf16 to vector<8x1x8xbf16>
    %19 = vector.extract_strided_slice %17 {offsets = [0, 0, 0], sizes = [8, 7, 8], strides = [1, 1, 1]} : vector<8x8x8xbf16> to vector<8x7x8xbf16>
    %20 = tpu.concatenate %18, %19 in 1 : vector<8x1x8xbf16>, vector<8x7x8xbf16> -> vector<8x8x8xbf16>
    %21 = vector.extract_strided_slice %1 {offsets = [0, 0, 24], sizes = [8, 8, 8], strides = [1, 1, 1]} : vector<8x8x32xbf16> to vector<8x8x8xbf16>
    %cst_14 = arith.constant 0.000000e+00 : bf16
    %22 = vector.broadcast %cst_14 : bf16 to vector<8x1x8xbf16>
    %23 = vector.extract_strided_slice %21 {offsets = [0, 0, 0], sizes = [8, 7, 8], strides = [1, 1, 1]} : vector<8x8x8xbf16> to vector<8x7x8xbf16>
    %24 = tpu.concatenate %22, %23 in 1 : vector<8x1x8xbf16>, vector<8x7x8xbf16> -> vector<8x8x8xbf16>
    %25 = vector.extract_strided_slice %8 {offsets = [0, 0, 24], sizes = [8, 8, 8], strides = [1, 1, 1]} : vector<8x8x32xbf16> to vector<8x8x8xbf16>
    %cst_15 = arith.constant 0.000000e+00 : bf16
    %26 = vector.broadcast %cst_15 : bf16 to vector<8x1x8xbf16>
    %27 = vector.extract_strided_slice %25 {offsets = [0, 0, 0], sizes = [8, 7, 8], strides = [1, 1, 1]} : vector<8x8x8xbf16> to vector<8x7x8xbf16>
    %28 = tpu.concatenate %26, %27 in 1 : vector<8x1x8xbf16>, vector<8x7x8xbf16> -> vector<8x8x8xbf16>
    %29 = tpu.concatenate %20, %24, %28 in 2 : vector<8x8x8xbf16>, vector<8x8x8xbf16>, vector<8x8x8xbf16> -> vector<8x8x24xbf16>
    %30 = vector.shape_cast %29 : vector<8x8x24xbf16> to vector<64x24xbf16>
    %c0_16 = arith.constant 0 : index
    %c0_17 = arith.constant 0 : index
    %31 = vector.load %arg7[%c0_16, %c0_17] : memref<24x8xbf16, #tpu.memory_space<vmem>>, vector<24x8xbf16>
    %cst_18 = arith.constant dense<0.000000e+00> : vector<64x8xf32>
    %32 = tpu.matmul %30, %31, %cst_18 {dimension_numbers = #tpu.dot_dimension_numbers<[1], [0], [0], [1], [0, 0, 1, 1], [], []>} : vector<64x24xbf16>, vector<24x8xbf16>, vector<64x8xf32> -> vector<64x8xf32>
    %33 = arith.addf %16, %32 : vector<64x8xf32>
    %c0_19 = arith.constant 0 : index
    %c0_20 = arith.constant 0 : index
    %34 = vector.load %arg8[%c0_19, %c0_20] : memref<1x8xf32, #tpu.memory_space<vmem>>, vector<1x8xf32>
    %35 = vector.broadcast %34 : vector<1x8xf32> to vector<64x8xf32>
    %36 = arith.addf %33, %35 : vector<64x8xf32>
    %cst_21 = arith.constant 0.000000e+00 : f32
    %37 = vector.broadcast %cst_21 : f32 to vector<64x8xf32>
    %38 = arith.subf %37, %36 : vector<64x8xf32>
    %39 = math.exp %38 : vector<64x8xf32>
    %cst_22 = arith.constant 1.000000e+00 : f32
    %40 = vector.broadcast %cst_22 : f32 to vector<64x8xf32>
    %41 = arith.addf %40, %39 : vector<64x8xf32>
    %42 = tpu.reciprocal %41 {approx = true} : vector<64x8xf32> -> vector<64x8xf32>
    %43 = arith.mulf %36, %42 : vector<64x8xf32>
    %44 = vector.shape_cast %43 : vector<64x8xf32> to vector<8x8x8xf32>
    %c0_23 = arith.constant 0 : index
    %c0_24 = arith.constant 0 : index
    %c0_25 = arith.constant 0 : index
    %c0_26 = arith.constant 0 : index
    %45 = vector.load %arg4[%c0_23, %c0_24, %c0_25, %c0_26] : memref<1x8x8x8xbf16, #tpu.memory_space<vmem>>, vector<1x8x8x8xbf16>
    %46 = vector.shape_cast %45 : vector<1x8x8x8xbf16> to vector<8x8x8xbf16>
    %47 = arith.extf %46 : vector<8x8x8xbf16> to vector<8x8x8xf32>
    %48 = tpu.concatenate %44, %47 in 2 : vector<8x8x8xf32>, vector<8x8x8xf32> -> vector<8x8x16xf32>
    %c0_27 = arith.constant 0 : index
    %c0_28 = arith.constant 0 : index
    %c0_29 = arith.constant 0 : index
    %c0_30 = arith.constant 0 : index
    %49 = vector.load %arg9[%c0_27, %c0_28, %c0_29, %c0_30] : memref<1x8x8x16xf32, #tpu.memory_space<vmem>>, vector<1x8x8x16xf32>
    %50 = vector.shape_cast %49 : vector<1x8x8x16xf32> to vector<8x8x16xf32>
    %51 = vector.shape_cast %48 : vector<8x8x16xf32> to vector<1x8x8x16xf32>
    tpu.vector_store %arg9[%c0_27, %c0_28, %c0_29, %c0_30], %51 {strides = array<i32>} : memref<1x8x8x16xf32, #tpu.memory_space<vmem>>, vector<1x8x8x16xf32>,
    return
  }
  func.func @transform_0(%arg0: i32, %arg1: i32) -> (i32, i32, i32, i32) {
    %c0_i32 = arith.constant 0 : i32
    %c0_i32_0 = arith.constant 0 : i32
    %c0_i32_1 = arith.constant 0 : i32
    return %arg0, %arg1, %c0_i32, %c0_i32_0 : i32, i32, i32, i32
  }
  func.func @transform_1(%arg0: i32, %arg1: i32) -> (i32, i32, i32, i32) {
    %c8_i32 = arith.constant 8 : i32
    %0 = arith.muli %arg1, %c8_i32 : i32
    %c1_i32 = arith.constant 1 : i32
    %1 = arith.subi %0, %c1_i32 : i32
    %c0_i32 = arith.constant 0 : i32
    %2 = arith.maxsi %1, %c0_i32 : i32
    %c0_i32_0 = arith.constant 0 : i32
    %c0_i32_1 = arith.constant 0 : i32
    %c0_i32_2 = arith.constant 0 : i32
    return %arg0, %2, %c0_i32_0, %c0_i32_1 : i32, i32, i32, i32
  }
  func.func @transform_2(%arg0: i32, %arg1: i32) -> (i32, i32, i32, i32) {
    %c0_i32 = arith.constant 0 : i32
    %c0_i32_0 = arith.constant 0 : i32
    %c0_i32_1 = arith.constant 0 : i32
    return %arg0, %arg1, %c0_i32, %c0_i32_0 : i32, i32, i32, i32
  }
  func.func @transform_3(%arg0: i32, %arg1: i32) -> (i32, i32) {
    %c0_i32 = arith.constant 0 : i32
    %c0_i32_0 = arith.constant 0 : i32
    %c0_i32_1 = arith.constant 0 : i32
    return %c0_i32, %c0_i32_0 : i32, i32
  }
  func.func @transform_4(%arg0: i32, %arg1: i32) -> (i32, i32) {
    %c0_i32 = arith.constant 0 : i32
    %c0_i32_0 = arith.constant 0 : i32
    %c0_i32_1 = arith.constant 0 : i32
    return %c0_i32, %c0_i32_0 : i32, i32
  }
  func.func @transform_5(%arg0: i32, %arg1: i32) -> (i32, i32) {
    %c0_i32 = arith.constant 0 : i32
    %c0_i32_0 = arith.constant 0 : i32
    %c0_i32_1 = arith.constant 0 : i32
    return %c0_i32, %c0_i32_0 : i32, i32
  }
  func.func @transform_6(%arg0: i32, %arg1: i32) -> (i32, i32) {
    %c0_i32 = arith.constant 0 : i32
    %c0_i32_0 = arith.constant 0 : i32
    %c0_i32_1 = arith.constant 0 : i32
    return %c0_i32, %c0_i32_0 : i32, i32
  }
  func.func @transform_7(%arg0: i32, %arg1: i32) -> (i32, i32, i32, i32) {
    %c0_i32 = arith.constant 0 : i32
    %c0_i32_0 = arith.constant 0 : i32
    %c0_i32_1 = arith.constant 0 : i32
    return %arg0, %arg1, %c0_i32, %c0_i32_0 : i32, i32, i32, i32
  }
}

module attributes {stable_mosaic.version = 11 : i64} {
  func.func @_pool_cv1_cv2_kernel(%arg0: i32, %arg1: memref<4x8x8x4xf32, #tpu.memory_space<vmem>>, %arg2: memref<4x8xbf16, #tpu.memory_space<vmem>>, %arg3: memref<1x8xf32, #tpu.memory_space<vmem>>, %arg4: memref<4x8xbf16, #tpu.memory_space<vmem>>, %arg5: memref<1x8xf32, #tpu.memory_space<vmem>>, %arg6: memref<8x8x8xbf16, #tpu.memory_space<vmem>>, %arg7: memref<8x8x32xbf16, #tpu.memory_space<vmem>>) attributes {dimension_semantics = [#tpu.dimension_semantics<parallel>], iteration_bounds = array<i64: 2>, scalar_prefetch = 0 : i64, scratch_operands = 0 : i64, tpu.core_type = #tpu.core_type<tc>, window_params = [{transform_indices = @transform_0, window_bounds = array<i64: 4, 8, 8, 4>}, {pipeline_mode = #tpu.pipeline_mode<synchronous>, transform_indices = @transform_1, window_bounds = array<i64: 4, 8>}, {pipeline_mode = #tpu.pipeline_mode<synchronous>, transform_indices = @transform_2, window_bounds = array<i64: 1, 8>}, {pipeline_mode = #tpu.pipeline_mode<synchronous>, transform_indices = @transform_3, window_bounds = array<i64: 4, 8>}, {pipeline_mode = #tpu.pipeline_mode<synchronous>, transform_indices = @transform_4, window_bounds = array<i64: 1, 8>}, {transform_indices = @transform_5, window_bounds = array<i64: 8, 8, 8>}, {transform_indices = @transform_6, window_bounds = array<i64: 8, 8, 32>}]} {
    %c0 = arith.constant 0 : index
    %c0_0 = arith.constant 0 : index
    %c0_1 = arith.constant 0 : index
    %c0_2 = arith.constant 0 : index
    %0 = vector.load %arg1[%c0, %c0_0, %c0_1, %c0_2] : memref<4x8x8x4xf32, #tpu.memory_space<vmem>>, vector<4x8x8x4xf32>
    %1 = vector.shape_cast %0 : vector<4x8x8x4xf32> to vector<256x4xf32>
    %2 = arith.truncf %1 : vector<256x4xf32> to vector<256x4xbf16>
    %c0_3 = arith.constant 0 : index
    %c0_4 = arith.constant 0 : index
    %3 = vector.load %arg4[%c0_3, %c0_4] : memref<4x8xbf16, #tpu.memory_space<vmem>>, vector<4x8xbf16>
    %cst = arith.constant dense<0.000000e+00> : vector<256x8xf32>
    %4 = tpu.matmul %2, %3, %cst {dimension_numbers = #tpu.dot_dimension_numbers<[1], [0], [0], [1], [0, 0, 1, 1], [], []>} : vector<256x4xbf16>, vector<4x8xbf16>, vector<256x8xf32> -> vector<256x8xf32>
    %c0_5 = arith.constant 0 : index
    %c0_6 = arith.constant 0 : index
    %5 = vector.load %arg5[%c0_5, %c0_6] : memref<1x8xf32, #tpu.memory_space<vmem>>, vector<1x8xf32>
    %6 = vector.broadcast %5 : vector<1x8xf32> to vector<256x8xf32>
    %7 = arith.addf %4, %6 : vector<256x8xf32>
    %cst_7 = arith.constant 0.000000e+00 : f32
    %8 = vector.broadcast %cst_7 : f32 to vector<256x8xf32>
    %9 = arith.subf %8, %7 : vector<256x8xf32>
    %10 = math.exp %9 : vector<256x8xf32>
    %cst_8 = arith.constant 1.000000e+00 : f32
    %11 = vector.broadcast %cst_8 : f32 to vector<256x8xf32>
    %12 = arith.addf %11, %10 : vector<256x8xf32>
    %13 = tpu.reciprocal %12 : vector<256x8xf32> -> vector<256x8xf32>
    %14 = arith.mulf %7, %13 : vector<256x8xf32>
    %15 = arith.truncf %14 : vector<256x8xf32> to vector<256x8xbf16>
    %16 = vector.shape_cast %15 : vector<256x8xbf16> to vector<4x8x8x8xbf16>
    %17 = vector.extract_strided_slice %16 {offsets = [0, 0, 0, 0], sizes = [1, 8, 8, 8], strides = [1, 1, 1, 1]} : vector<4x8x8x8xbf16> to vector<1x8x8x8xbf16>
    %18 = vector.shape_cast %17 : vector<1x8x8x8xbf16> to vector<8x8x8xbf16>
    %19 = vector.extract_strided_slice %16 {offsets = [1, 0, 0, 0], sizes = [1, 8, 8, 8], strides = [1, 1, 1, 1]} : vector<4x8x8x8xbf16> to vector<1x8x8x8xbf16>
    %20 = vector.shape_cast %19 : vector<1x8x8x8xbf16> to vector<8x8x8xbf16>
    %21 = vector.extract_strided_slice %16 {offsets = [2, 0, 0, 0], sizes = [1, 8, 8, 8], strides = [1, 1, 1, 1]} : vector<4x8x8x8xbf16> to vector<1x8x8x8xbf16>
    %22 = vector.shape_cast %21 : vector<1x8x8x8xbf16> to vector<8x8x8xbf16>
    %23 = vector.extract_strided_slice %16 {offsets = [3, 0, 0, 0], sizes = [1, 8, 8, 8], strides = [1, 1, 1, 1]} : vector<4x8x8x8xbf16> to vector<1x8x8x8xbf16>
    %24 = vector.shape_cast %23 : vector<1x8x8x8xbf16> to vector<8x8x8xbf16>
    %25 = tpu.concatenate %18, %20, %22, %24 in 2 : vector<8x8x8xbf16>, vector<8x8x8xbf16>, vector<8x8x8xbf16>, vector<8x8x8xbf16> -> vector<8x8x32xbf16>
    %c0_9 = arith.constant 0 : index
    %c0_10 = arith.constant 0 : index
    %c0_11 = arith.constant 0 : index
    %26 = vector.load %arg7[%c0_9, %c0_10, %c0_11] : memref<8x8x32xbf16, #tpu.memory_space<vmem>>, vector<8x8x32xbf16>
    tpu.vector_store %arg7[%c0_9, %c0_10, %c0_11], %25 {strides = array<i32>} : memref<8x8x32xbf16, #tpu.memory_space<vmem>>, vector<8x8x32xbf16>,
    %cst_12 = arith.constant dense<0xFF800000> : vector<8x8x4xf32>
    %27 = vector.multi_reduction <maximumf>, %0, %cst_12 [0] : vector<4x8x8x4xf32> to vector<8x8x4xf32>
    %28 = vector.shape_cast %27 : vector<8x8x4xf32> to vector<64x4xf32>
    %29 = arith.truncf %28 : vector<64x4xf32> to vector<64x4xbf16>
    %c0_13 = arith.constant 0 : index
    %c0_14 = arith.constant 0 : index
    %30 = vector.load %arg2[%c0_13, %c0_14] : memref<4x8xbf16, #tpu.memory_space<vmem>>, vector<4x8xbf16>
    %cst_15 = arith.constant dense<0.000000e+00> : vector<64x8xf32>
    %31 = tpu.matmul %29, %30, %cst_15 {dimension_numbers = #tpu.dot_dimension_numbers<[1], [0], [0], [1], [0, 0, 1, 1], [], []>} : vector<64x4xbf16>, vector<4x8xbf16>, vector<64x8xf32> -> vector<64x8xf32>
    %c0_16 = arith.constant 0 : index
    %c0_17 = arith.constant 0 : index
    %32 = vector.load %arg3[%c0_16, %c0_17] : memref<1x8xf32, #tpu.memory_space<vmem>>, vector<1x8xf32>
    %33 = vector.broadcast %32 : vector<1x8xf32> to vector<64x8xf32>
    %34 = arith.addf %31, %33 : vector<64x8xf32>
    %cst_18 = arith.constant 0.000000e+00 : f32
    %35 = vector.broadcast %cst_18 : f32 to vector<64x8xf32>
    %36 = arith.subf %35, %34 : vector<64x8xf32>
    %37 = math.exp %36 : vector<64x8xf32>
    %cst_19 = arith.constant 1.000000e+00 : f32
    %38 = vector.broadcast %cst_19 : f32 to vector<64x8xf32>
    %39 = arith.addf %38, %37 : vector<64x8xf32>
    %40 = tpu.reciprocal %39 {approx = true} : vector<64x8xf32> -> vector<64x8xf32>
    %41 = arith.mulf %34, %40 : vector<64x8xf32>
    %42 = vector.shape_cast %41 : vector<64x8xf32> to vector<8x8x8xf32>
    %43 = arith.truncf %42 : vector<8x8x8xf32> to vector<8x8x8xbf16>
    %c0_20 = arith.constant 0 : index
    %c0_21 = arith.constant 0 : index
    %c0_22 = arith.constant 0 : index
    %44 = vector.load %arg6[%c0_20, %c0_21, %c0_22] : memref<8x8x8xbf16, #tpu.memory_space<vmem>>, vector<8x8x8xbf16>
    tpu.vector_store %arg6[%c0_20, %c0_21, %c0_22], %43 {strides = array<i32>} : memref<8x8x8xbf16, #tpu.memory_space<vmem>>, vector<8x8x8xbf16>,
    return
  }
  func.func @transform_0(%arg0: i32) -> (i32, i32, i32, i32) {
    %c0_i32 = arith.constant 0 : i32
    %c0_i32_0 = arith.constant 0 : i32
    %c0_i32_1 = arith.constant 0 : i32
    %c0_i32_2 = arith.constant 0 : i32
    return %c0_i32, %arg0, %c0_i32_0, %c0_i32_1 : i32, i32, i32, i32
  }
  func.func @transform_1(%arg0: i32) -> (i32, i32) {
    %c0_i32 = arith.constant 0 : i32
    %c0_i32_0 = arith.constant 0 : i32
    %c0_i32_1 = arith.constant 0 : i32
    return %c0_i32, %c0_i32_0 : i32, i32
  }
  func.func @transform_2(%arg0: i32) -> (i32, i32) {
    %c0_i32 = arith.constant 0 : i32
    %c0_i32_0 = arith.constant 0 : i32
    %c0_i32_1 = arith.constant 0 : i32
    return %c0_i32, %c0_i32_0 : i32, i32
  }
  func.func @transform_3(%arg0: i32) -> (i32, i32) {
    %c0_i32 = arith.constant 0 : i32
    %c0_i32_0 = arith.constant 0 : i32
    %c0_i32_1 = arith.constant 0 : i32
    return %c0_i32, %c0_i32_0 : i32, i32
  }
  func.func @transform_4(%arg0: i32) -> (i32, i32) {
    %c0_i32 = arith.constant 0 : i32
    %c0_i32_0 = arith.constant 0 : i32
    %c0_i32_1 = arith.constant 0 : i32
    return %c0_i32, %c0_i32_0 : i32, i32
  }
  func.func @transform_5(%arg0: i32) -> (i32, i32, i32) {
    %c0_i32 = arith.constant 0 : i32
    %c0_i32_0 = arith.constant 0 : i32
    %c0_i32_1 = arith.constant 0 : i32
    return %arg0, %c0_i32, %c0_i32_0 : i32, i32, i32
  }
  func.func @transform_6(%arg0: i32) -> (i32, i32, i32) {
    %c0_i32 = arith.constant 0 : i32
    %c0_i32_0 = arith.constant 0 : i32
    %c0_i32_1 = arith.constant 0 : i32
    return %arg0, %c0_i32, %c0_i32_0 : i32, i32, i32
  }
}

</mosaic_0001>

<bundles_post_ra>
// kernel: transition_block_forward.2
= control target key start
LH: loop header
LB: loop body
LE: loop exit
PB: predicated region body
PF: predicated region fallthrough
CT: control target
= control target key end

     0   :  { %s1841_s21 = smov 0   ;;  %s1843_s22 = smov 0   ;;  %s2467_s0 = inlined_call_operand.vmem [shape: f32[4,16,8,4], index: 0, kind: input, shape index: {}]   ;;  %s2468_s1 = inlined_call_operand.vmem [shape: bf16[4,8], index: 1, kind: input, shape index: {}]   ;;  %s2469_s2 = inlined_call_operand.vmem [shape: f32[1,8], index: 2, kind: input, shape index: {}]   ;;  %s2470_s3 = inlined_call_operand.vmem [shape: bf16[4,8], index: 3, kind: input, shape index: {}]   ;;  %s2471_s4 = inlined_call_operand.vmem [shape: f32[1,8], index: 4, kind: input, shape index: {}]   ;;  %s2472_s5 = inlined_call_operand.vmem [shape: bf16[16,8,8], index: 5, kind: output, shape index: {0}]   ;;  %s2473_s6 = inlined_call_operand.vmem [shape: bf16[16,8,32], index: 6, kind: output, shape index: {1}]  }
   0x1   :  { %s1845_s23 = smov 0  }
   0x2 LB: > { %s1419_s24 = sadd.s32 4294967295, %s1801_s23   ;;  %s1858_s25 = sadd.s32 1, %s1801_s23   ;;  %s1801_s23 = sphi %s1845_s23, %s2476_s23   ;;  %s1797_s22 = sphi %s1843_s22, %s2475_s22   ;;  %s1793_s21 = sphi %s1841_s21, %s2474_s21  }
   0x3   : > { %s21_s26 = ssub.s32 %s1801_s23, %s1858_s25  ;;  %s24_s27 = sadd.s32 1, %s1797_s22 }
   0x4   : > { %p22_p0 = scmp.eq.s32.totalorder %s21_s26, 0  ;;  %p31_p1 = scmp.ne.s32.totalorder %s1797_s22, %s1793_s21 }
   0x5   : > { %p32_p2 = scmp.eq.s32.totalorder %s1801_s23, 0  ;;  %p1422_p4 = scmp.ge.s32.totalorder %s1801_s23, 2 }
   0x6   : > { %s1867_s28 = scalar_select %p22_p0, %s1797_s22, %s24_s27  }
   0x7   : > { %p33_p3 = por %p32_p2, %p31_p1  ;;  %205 = sbr.rel (%p1422_p4) target bundleno = 34 (0x22), region = 32 }
   0xe   : > { %208 = sbr.rel (!%p33_p3) target bundleno = 34 (0x22), region = 36  ;;  %s210_s29 = sand.u32 (%p33_p3), 1, %s1797_s22  }
   0xf   : > { %s1488_s30 = sshll.u32 (%p33_p3), %s1801_s23, 6  ;;  %s1423_s7 = sshll.u32 (%p33_p3), %s210_s29, 8 }
  0x10   : > { %s1875_s10 = scalar_lea.vmem (%p33_p3), %s2467_s0, %s1488_s30  ;;  %s1880_s11 = scalar_lea.vmem (%p33_p3), [#allocation2], %s1423_s7 }
  0x11   : > { %v305_v0 = vld [vmem:[%s1875_s10] sm:$0xff] (%p33_p3)  ;;  %v307_v1 = vld [vmem:[%s1875_s10 + $0x8] sm:$0xff] (%p33_p3)  ;;  %v309_v2 = vld [vmem:[%s1875_s10 + $0x10] sm:$0xff] (%p33_p3) }
  0x12   : > { %306 = vst [vmem:[%s1880_s11] sm:$0xff] (%p33_p3), %v305_v0  ;;  %308 = vst [vmem:[%s1880_s11 + $0x8] sm:$0xff] (%p33_p3), %v307_v1  ;;  %v311_v3 = vld [vmem:[%s1875_s10 + $0x18] sm:$0xff] (%p33_p3)  ;;  %v313_v4 = vld [vmem:[%s1875_s10 + $0x20] sm:$0xff] (%p33_p3) }
  0x13   : > { %310 = vst [vmem:[%s1880_s11 + $0x10] sm:$0xff] (%p33_p3), %v309_v2  ;;  %v315_v5 = vld [vmem:[%s1875_s10 + $0x28] sm:$0xff] (%p33_p3)  ;;  %312 = vst [vmem:[%s1880_s11 + $0x18] sm:$0xff] (%p33_p3), %v311_v3  ;;  %v317_v6 = vld [vmem:[%s1875_s10 + $0x30] sm:$0xff] (%p33_p3) }
  0x14   : > { %314 = vst [vmem:[%s1880_s11 + $0x20] sm:$0xff] (%p33_p3), %v313_v4  ;;  %316 = vst [vmem:[%s1880_s11 + $0x28] sm:$0xff] (%p33_p3), %v315_v5  ;;  %v319_v7 = vld [vmem:[%s1875_s10 + $0x38] sm:$0xff] (%p33_p3)  ;;  %v321_v8 = vld [vmem:[%s1875_s10 + $0x80] sm:$0xff] (%p33_p3) }
  0x15   : > { %318 = vst [vmem:[%s1880_s11 + $0x30] sm:$0xff] %v317_v6  ;;  %320 = vst [vmem:[%s1880_s11 + $0x38] sm:$0xff] %v319_v7  ;;  %v323_v9 = vld [vmem:[%s1875_s10 + $0x88] sm:$0xff]  ;;  %v325_v10 = vld [vmem:[%s1875_s10 + $0x90] sm:$0xff] }
  0x16   : > { %322 = vst [vmem:[%s1880_s11 + $0x40] sm:$0xff] %v321_v8  ;;  %v327_v11 = vld [vmem:[%s1875_s10 + $0x98] sm:$0xff]  ;;  %324 = vst [vmem:[%s1880_s11 + $0x48] sm:$0xff] %v323_v9  ;;  %v329_v12 = vld [vmem:[%s1875_s10 + $0xa0] sm:$0xff] }
  0x17   : > { %326 = vst [vmem:[%s1880_s11 + $0x50] sm:$0xff] %v325_v10  ;;  %328 = vst [vmem:[%s1880_s11 + $0x58] sm:$0xff] %v327_v11  ;;  %v331_v13 = vld [vmem:[%s1875_s10 + $0xa8] sm:$0xff]  ;;  %v333_v14 = vld [vmem:[%s1875_s10 + $0xb0] sm:$0xff] }
  0x18   : > { %330 = vst [vmem:[%s1880_s11 + $0x60] sm:$0xff] %v329_v12  ;;  %332 = vst [vmem:[%s1880_s11 + $0x68] sm:$0xff] %v331_v13  ;;  %v335_v15 = vld [vmem:[%s1875_s10 + $0xb8] sm:$0xff]  ;;  %v337_v16 = vld [vmem:[%s1875_s10 + $0x100] sm:$0xff] }
  0x19   : > { %334 = vst [vmem:[%s1880_s11 + $0x70] sm:$0xff] %v333_v14  ;;  %v339_v17 = vld [vmem:[%s1875_s10 + $0x108] sm:$0xff]  ;;  %336 = vst [vmem:[%s1880_s11 + $0x78] sm:$0xff] %v335_v15  ;;  %v341_v18 = vld [vmem:[%s1875_s10 + $0x110] sm:$0xff] }
  0x1a   : > { %338 = vst [vmem:[%s1880_s11 + $0x80] sm:$0xff] %v337_v16  ;;  %340 = vst [vmem:[%s1880_s11 + $0x88] sm:$0xff] %v339_v17  ;;  %v343_v19 = vld [vmem:[%s1875_s10 + $0x118] sm:$0xff]  ;;  %v345_v20 = vld [vmem:[%s1875_s10 + $0x120] sm:$0xff] }
  0x1b   : > { %342 = vst [vmem:[%s1880_s11 + $0x90] sm:$0xff] %v341_v18  ;;  %344 = vst [vmem:[%s1880_s11 + $0x98] sm:$0xff] %v343_v19  ;;  %v347_v21 = vld [vmem:[%s1875_s10 + $0x128] sm:$0xff]  ;;  %v349_v22 = vld [vmem:[%s1875_s10 + $0x130] sm:$0xff] }
  0x1c   : > { %346 = vst [vmem:[%s1880_s11 + $0xa0] sm:$0xff] %v345_v20  ;;  %v351_v23 = vld [vmem:[%s1875_s10 + $0x138] sm:$0xff]  ;;  %348 = vst [vmem:[%s1880_s11 + $0xa8] sm:$0xff] %v347_v21  ;;  %v353_v24 = vld [vmem:[%s1875_s10 + $0x180] sm:$0xff] }
  0x1d   : > { %350 = vst [vmem:[%s1880_s11 + $0xb0] sm:$0xff] %v349_v22  ;;  %352 = vst [vmem:[%s1880_s11 + $0xb8] sm:$0xff] %v351_v23  ;;  %v355_v25 = vld [vmem:[%s1875_s10 + $0x188] sm:$0xff]  ;;  %v357_v26 = vld [vmem:[%s1875_s10 + $0x190] sm:$0xff] }
  0x1e   : > { %354 = vst [vmem:[%s1880_s11 + $0xc0] sm:$0xff] %v353_v24  ;;  %356 = vst [vmem:[%s1880_s11 + $0xc8] sm:$0xff] %v355_v25  ;;  %v359_v27 = vld [vmem:[%s1875_s10 + $0x198] sm:$0xff]  ;;  %v361_v28 = vld [vmem:[%s1875_s10 + $0x1a0] sm:$0xff] }
  0x1f   : > { %358 = vst [vmem:[%s1880_s11 + $0xd0] sm:$0xff] %v357_v26  ;;  %v363_v29 = vld [vmem:[%s1875_s10 + $0x1a8] sm:$0xff]  ;;  %360 = vst [vmem:[%s1880_s11 + $0xd8] sm:$0xff] %v359_v27  ;;  %v365_v30 = vld [vmem:[%s1875_s10 + $0x1b0] sm:$0xff] }
  0x20   : > { %362 = vst [vmem:[%s1880_s11 + $0xe0] sm:$0xff] %v361_v28  ;;  %364 = vst [vmem:[%s1880_s11 + $0xe8] sm:$0xff] %v363_v29  ;;  %v367_v31 = vld [vmem:[%s1875_s10 + $0x1b8] sm:$0xff] }
  0x21   : > { %366 = vst [vmem:[%s1880_s11 + $0xf0] sm:$0xff] %v365_v30  ;;  %368 = vst [vmem:[%s1880_s11 + $0xf8] sm:$0xff] %v367_v31 }
  0x22 PF: > { %p1426_p5 = scmp.ge.s32.totalorder %s1801_s23, 1  ;;  %p373_p6 = scmp.lt.s32.totalorder %s1801_s23, 3 }
  0x24   : > { %p374_p7 = pnand %p1426_p5, %p373_p6 }
  0x25   : > { %v476_v32 = vld [vmem:[%s2470_s3] sm:$0x3] (!%p374_p7)  ;;  %vm533_vm0 = vcmask (!%p374_p7), 1041408   ;;  %s380_s14 = sand.u32 (!%p374_p7), 1, %s1793_s21   ;;  %vm484_vm1 = vcmask (!%p374_p7), 31744   ;;  %s1803_s21 = smov (!%p374_p7), 16  }
  0x26   : > { %377 = sbr.rel (%p374_p7) target bundleno = 473 (0x1d9), region = 74  ;;  %1589 = vmatprep.subr.msk.bf16.mxu0 (!%p374_p7), %vm533_vm0, %v476_v32  ;;  %1590 = vmatprep.subr.msk.bf16.mxu1 (!%p374_p7), %vm533_vm0, %v476_v32  ;;  %v535_v33 = vsel (!%p374_p7), %vm533_vm0, %v476_v32, 0  ;;  %s1427_s15 = sshll.u32 (!%p374_p7), %s380_s14, 8  ;;  %v1170_v34 = vld [vmem:[%s2468_s1] sm:$0x3] (!%p374_p7)  ;;  %vm1314_vm2 = vcmask (!%p374_p7), 60416  }
  0x27   : > { %1544 = vmatpush3.bf16.msra.mxu0 (!%p374_p7), %v535_v33  ;;  %1588 = vmatpush3.bf16.msra.mxu1 (!%p374_p7), %v535_v33  ;;  %s1955_s18 = scalar_lea.vmem (!%p374_p7), [#allocation2], %s1427_s15  ;;  %v1191_v59 = vsel (!%p374_p7), %vm533_vm0, %v1170_v34, 0  ;;  %s1804_s29 = smov (!%p374_p7), 24   ;;  %vm1034_vm3 = vcmask (!%p374_p7), 64512   ;;  %vm1076_vm4 = vcmask (!%p374_p7), 195584   ;;  %vm1059_vm5 = vcmask (!%p374_p7), 130048  }
  0x28   : > { %v428_v35 = vld [vmem:[%s1955_s18] sm:$0xff] (!%p374_p7)  ;;  %v429_v36 = vld [vmem:[%s1955_s18 + $0x8] sm:$0xff] (!%p374_p7)  ;;  %1591 = vmatprep.subr.msk.bf16.mxu1 (!%p374_p7), %vm533_vm0, %v1170_v34  ;;  %v430_v46 = vld [vmem:[%s1955_s18 + $0x10] sm:$0xff] (!%p374_p7)  ;;  %s1805_s30 = smov (!%p374_p7), 8   ;;  %s1428_s7 = sshll.u32 (!%p374_p7), %s1419_s24, 3  ;;  %vm1101_vm6 = vcmask (!%p374_p7), 257024  }
  0x29   : > { %v460_v37 = vpack.c.bf16 (!%p374_p7), %v429_v36, %v428_v35  ;;  %v1961_v38 = vld [vmem:[%s1955_s18 + $0x40] sm:$0xff] (!%p374_p7)  ;;  %v1965_v39 = vld [vmem:[%s1955_s18 + $0x48] sm:$0xff] (!%p374_p7)  ;;  %v1110_v42 = vsel (!%p374_p7), %vm484_vm1, %v428_v35, -inf  ;;  %v431_v47 = vld [vmem:[%s1955_s18 + $0x18] sm:$0xff] (!%p374_p7)  ;;  %v1117_v53 = vsel (!%p374_p7), %vm484_vm1, %v429_v36, -inf  ;;  %v1124_v17 = vsel (!%p374_p7), %vm484_vm1, %v430_v46, -inf }
  0x2a   : > { %v448_v40 = vld [vmem:[%s1955_s18 + $0xa0] sm:$0xff] (!%p374_p7)  ;;  %v449_v41 = vld [vmem:[%s1955_s18 + $0xa8] sm:$0xff] (!%p374_p7)  ;;  %v1111_v43 = vsel (!%p374_p7), %vm484_vm1, %v1961_v38, -inf  ;;  %v1977_v49 = vld [vmem:[%s1955_s18 + $0xb0] sm:$0xff] (!%p374_p7)  ;;  %v1118_v54 = vsel (!%p374_p7), %vm484_vm1, %v1965_v39, -inf  ;;  %v461_v55 = vpack.c.bf16 (!%p374_p7), %v431_v47, %v430_v46  ;;  %v464_v19 = vpack.c.bf16 (!%p374_p7), %v1965_v39, %v1961_v38  ;;  %p416_p8 = scmp.lt.s32.totalorder (!%p374_p7), %s1428_s7, 15 }
  0x2b   : > { %1545 = vmatprep.mubr.msk.bf16.mxu0 (!%p374_p7), %vm484_vm1, %v460_v37  ;;  %v432_v44 = vld [vmem:[%s1955_s18 + $0x20] sm:$0xff] (!%p374_p7)  ;;  %v470_v45 = vpack.c.bf16 (!%p374_p7), %v449_v41, %v448_v40  ;;  %v433_v48 = vld [vmem:[%s1955_s18 + $0x28] sm:$0xff] (!%p374_p7)  ;;  %v1980_v50 = vld [vmem:[%s1955_s18 + $0xb8] sm:$0xff] (!%p374_p7)  ;;  %v1112_v57 = vmax.f32 (!%p374_p7), %v1110_v42, %v1111_v43  ;;  %v1119_v63 = vmax.f32 (!%p374_p7), %v1117_v53, %v1118_v54  ;;  %v1131_v22 = vsel (!%p374_p7), %vm484_vm1, %v431_v47, -inf }
  0x2c   : > { %v452_v51 = vld [vmem:[%s1955_s18 + $0xc0] sm:$0xff] (!%p374_p7)  ;;  %v453_v52 = vld [vmem:[%s1955_s18 + $0xc8] sm:$0xff] (!%p374_p7)  ;;  %v471_v58 = vpack.c.bf16 (!%p374_p7), %v1980_v50, %v1977_v49  ;;  %1546 = vmatmul.mubr.msk.bf16.vlgmr.msra.gmra.mrb[0].mxu0 (!%p374_p7), %vm484_vm1, %v461_v55  ;;  %v462_v61 = vpack.c.bf16 (!%p374_p7), %v433_v48, %v432_v44  ;;  %v434_v1 = vld [vmem:[%s1955_s18 + $0x30] sm:$0xff] (!%p374_p7)  ;;  %v1138_v11 = vsel (!%p374_p7), %vm484_vm1, %v432_v44, -inf  ;;  %v1145_v13 = vsel (!%p374_p7), %vm484_vm1, %v433_v48, -inf }
  0x2d   : > { %1565 = vmatprep.mubr.msk.bf16.mxu1 %vm484_vm1, %v470_v45  ;;  %v1989_v56 = vld [vmem:[%s1955_s18 + $0x80] sm:$0xff]  ;;  %v1998_v62 = vld [vmem:[%s1955_s18 + $0x88] sm:$0xff]  ;;  %v472_v0 = vpack.c.bf16 %v453_v52, %v452_v51  ;;  %v435_v2 = vld [vmem:[%s1955_s18 + $0x38] sm:$0xff]  ;;  %v1115_v26 = vsel %vm484_vm1, %v452_v51, -inf  ;;  %v1122_v27 = vsel %vm484_vm1, %v453_v52, -inf  ;;  %v1141_v30 = vsel %vm484_vm1, %v448_v40, -inf }
  0x2e   : > { %v1113_v60 = vsel %vm484_vm1, %v1989_v56, -inf  ;;  %1566 = vmatmul.mubr.msk.bf16.vlgmr.msra.gmra.mrb[0].mxu1 %vm484_vm1, %v471_v58  ;;  %v1120_v3 = vsel %vm484_vm1, %v1998_v62, -inf  ;;  %v2006_v4 = vld [vmem:[%s1955_s18 + $0x60] sm:$0xff]  ;;  %1549 = vmatprep.mubr.msk.bf16.mxu0 %vm484_vm1, %v462_v61  ;;  %v454_v5 = vld [vmem:[%s1955_s18 + $0xd0] sm:$0xff]  ;;  %v455_v6 = vld [vmem:[%s1955_s18 + $0xd8] sm:$0xff]  ;;  %v463_v15 = vpack.c.bf16 %v435_v2, %v434_v1  ;;  %v1148_v31 = vsel %vm484_vm1, %v449_v41, -inf }
  0x2f   : > { %1578 = vmatpush3.bf16.msra.mxu1 %v1191_v59  ;;  %v1114_v7 = vmax.f32 %v1112_v57, %v1113_v60  ;;  %v441_v8 = vld [vmem:[%s1955_s18 + $0x68] sm:$0xff]  ;;  %v456_v9 = vld [vmem:[%s1955_s18 + $0xe0] sm:$0xff]  ;;  %1569 = vmatprep.mubr.msk.bf16.mxu1 %vm484_vm1, %v472_v0  ;;  %v1139_v12 = vsel %vm484_vm1, %v2006_v4, -inf  ;;  %v1121_v16 = vmax.f32 %v1119_v63, %v1120_v3  ;;  %v473_v18 = vpack.c.bf16 %v455_v6, %v454_v5  ;;  %v438_v20 = vld [vmem:[%s1955_s18 + $0x50] sm:$0xff]  ;;  %s2478_s7 = smov (!%p416_p8, %s1428_s7), 15 }
  0x30   : > { %v457_v10 = vld [vmem:[%s1955_s18 + $0xe8] sm:$0xff]  ;;  %v1146_v14 = vsel %vm484_vm1, %v441_v8, -inf  ;;  %v439_v21 = vld [vmem:[%s1955_s18 + $0x58] sm:$0xff]  ;;  %v1125_v24 = vsel %vm484_vm1, %v438_v20, -inf  ;;  %v1140_v28 = vmax.f32 %v1138_v11, %v1139_v12  ;;  %v458_v32 = vld [vmem:[%s1955_s18 + $0xf0] sm:$0xff]  ;;  %v1152_v44 = vsel %vm484_vm1, %v434_v1, -inf }
  0x31   : > { %v474_v23 = vpack.c.bf16 %v457_v10, %v456_v9  ;;  %v1132_v25 = vsel %vm484_vm1, %v439_v21, -inf  ;;  %v1147_v29 = vmax.f32 %v1145_v13, %v1146_v14  ;;  %v1126_v33 = vmax.f32 %v1124_v17, %v1125_v24  ;;  %v459_v35 = vld [vmem:[%s1955_s18 + $0xf8] sm:$0xff]  ;;  %v446_v36 = vld [vmem:[%s1955_s18 + $0x90] sm:$0xff]  ;;  %s1429_s23 = sshll.u32 %s2478_s7, 2 }
  0x32   : > { %v1133_v34 = vmax.f32 %v1131_v22, %v1132_v25  ;;  %v447_v37 = vld [vmem:[%s1955_s18 + $0x98] sm:$0xff]  ;;  %v1116_v38 = vmax.f32 %v1114_v7, %v1115_v26  ;;  %v1123_v39 = vmax.f32 %v1121_v16, %v1122_v27  ;;  %v1127_v40 = vsel %vm484_vm1, %v446_v36, -inf  ;;  %v442_v48 = vld [vmem:[%s1955_s18 + $0x70] sm:$0xff]  ;;  %s2328_s9 = scalar_lea.vmem %s2472_s5, %s1429_s23  ;;  %s2399_s12 = scalar_lea.vmem %s2473_s6, %s1429_s23 }
  0x33   : > { %v1134_v41 = vsel %vm484_vm1, %v447_v37, -inf  ;;  %v1142_v42 = vmax.f32 %v1140_v28, %v1141_v30  ;;  %v1149_v43 = vmax.f32 %v1147_v29, %v1148_v31  ;;  %v1159_v45 = vsel %vm484_vm1, %v435_v2, -inf  ;;  %v443_v52 = vld [vmem:[%s1955_s18 + $0x78] sm:$0xff] }
  0x34   : > { %1550 = vmatmul.mubr.msk.bf16.gmra.mrb[4].mxu0 %vm484_vm1, %v463_v15  ;;  %v465_v46 = vpack.c.bf16 %v439_v21, %v438_v20  ;;  %v475_v47 = vpack.c.bf16 %v459_v35, %v458_v32  ;;  %v466_v51 = vpack.c.bf16 %v441_v8, %v2006_v4  ;;  %v1153_v53 = vsel %vm484_vm1, %v442_v48, -inf }
  0x35   : > { %1553 = vmatprep.mubr.msk.bf16.mxu0 %vm484_vm1, %v464_v19  ;;  %v1128_v54 = vmax.f32 %v1126_v33, %v1127_v40  ;;  %v1135_v55 = vmax.f32 %v1133_v34, %v1134_v41  ;;  %v1129_v57 = vsel %vm484_vm1, %v454_v5, -inf  ;;  %v1136_v58 = vsel %vm484_vm1, %v455_v6, -inf }
  0x36   : > { %1570 = vmatmul.mubr.msk.bf16.gmra.mrb[4].mxu1 %vm484_vm1, %v473_v18  ;;  %v1160_v59 = vsel %vm484_vm1, %v443_v52, -inf  ;;  %v1166_v60 = vpack.c.bf16 %v1123_v39, %v1116_v38  ;;  %v1143_v61 = vsel %vm484_vm1, %v456_v9, -inf  ;;  %v1150_v63 = vsel %vm484_vm1, %v457_v10, -inf }
  0x37   : > { %1573 = vmatprep.mubr.msk.bf16.mxu1 %vm484_vm1, %v474_v23  ;;  %v1154_v0 = vmax.f32 %v1152_v44, %v1153_v53  ;;  %v1161_v1 = vmax.f32 %v1159_v45, %v1160_v59  ;;  %v1130_v2 = vmax.f32 %v1128_v54, %v1129_v57  ;;  %v1137_v3 = vmax.f32 %v1135_v55, %v1136_v58 }
  0x38   : > { %v1144_v4 = vmax.f32 %v1142_v42, %v1143_v61  ;;  %v1151_v5 = vmax.f32 %v1149_v43, %v1150_v63  ;;  %v1155_v6 = vsel %vm484_vm1, %v1977_v49, -inf  ;;  %v1162_v7 = vsel %vm484_vm1, %v1980_v50, -inf }
  0x39   : > { %v467_v8 = vpack.c.bf16 %v443_v52, %v442_v48  ;;  %v468_v9 = vpack.c.bf16 %v1998_v62, %v1989_v56  ;;  %v1167_v10 = vpack.c.bf16 %v1137_v3, %v1130_v2  ;;  %v1156_v11 = vmax.f32 %v1154_v0, %v1155_v6  ;;  %v2074_v62 = vld [vmem:[%s2471_s4] ss:$0 sm:$0xff] }
  0x3a   : > { %v1163_v12 = vmax.f32 %v1161_v1, %v1162_v7  ;;  %v1157_v13 = vsel %vm484_vm1, %v458_v32, -inf  ;;  %v1164_v14 = vsel %vm484_vm1, %v459_v35, -inf  ;;  %v1168_v15 = vpack.c.bf16 %v1151_v5, %v1144_v4 }
  0x3b   : > { %v1158_v49 = vmax.f32 %v1156_v11, %v1157_v13  ;;  %v469_v16 = vpack.c.bf16 %v447_v37, %v446_v36 }
  0x3c   : > { %1554 = vmatmul.mubr.msk.bf16.gmra.mrb[8].mxu0 %vm484_vm1, %v465_v46  ;;  %v1165_v50 = vmax.f32 %v1163_v12, %v1164_v14 }
  0x3d   : > { %1557 = vmatprep.mubr.msk.bf16.mxu0 %vm484_vm1, %v466_v51 }
  0x3e   : > { %1574 = vmatmul.mubr.msk.bf16.gmra.mrb[8].mxu1 %vm484_vm1, %v475_v47  ;;  %v1169_v56 = vpack.c.bf16 %v1165_v50, %v1158_v49 }
  0x3f   : > { %1579 = vmatprep.mubr.msk.bf16.mxu1 %vm484_vm1, %v1166_v60 }
  0x44   : > { %1558 = vmatmul.mubr.msk.bf16.gmra.mrb[12].mxu0 %vm484_vm1, %v467_v8 }
  0x45   : > { %1561 = vmatprep.mubr.msk.bf16.mxu0 %vm484_vm1, %v468_v9 }
  0x46   : > { %1580 = vmatmul.mubr.msk.bf16.vlgmr.msra.gmra.mrb[12].mxu1 %vm484_vm1, %v1167_v10 }
  0x47   : > { %1583 = vmatprep.mubr.msk.bf16.mxu1 %vm484_vm1, %v1168_v15 }
  0x4c   : > { %1562 = vmatmul.mubr.msk.bf16.gmra.mrb[16].mxu0 %vm484_vm1, %v469_v16 }
  0x4e   : > { %1584 = vmatmul.mubr.msk.bf16.gmra.mrb[16].mxu1 %vm484_vm1, %v1169_v56 }
  0xff   : > { %v1547_v17 = vpop.f32.mrb[0].mxu0 }
 0x100   : > { %v2077_v18 = vadd.f32 %v1547_v17, %v2074_v62  ;;  %v571_v20 = vpop.f32.mrb[1].mxu0 }
 0x101   : > { %v1567_v19 = vpop.f32.mrb[0].mxu1  ;;  %v2083_v22 = vadd.f32 %v2074_v62, %v571_v20  ;;  %v1548_v24 = vpop.f32.mrb[2].mxu0 }
 0x102   : > { %v2080_v21 = vadd.f32 %v1567_v19, %v2074_v62  ;;  %v651_v23 = vpop.f32.mrb[1].mxu1  ;;  %v2089_v26 = vadd.f32 %v1548_v24, %v2074_v62  ;;  %v574_v28 = vpop.f32.mrb[3].mxu0 }
 0x103   : > { %v2086_v25 = vadd.f32 %v2074_v62, %v651_v23  ;;  %v1568_v27 = vpop.f32.mrb[2].mxu1  ;;  %v2096_v31 = vadd.f32 %v2074_v62, %v574_v28 }
 0x104   : > { %v720_v29 = vsub.f32 0.0, %v2080_v21  ;;  %v2093_v30 = vadd.f32 %v1568_v27, %v2074_v62  ;;  %v654_v32 = vpop.f32.mrb[3].mxu1 }
 0x105   : > { %v718_v33 = vsub.f32 0.0, %v2086_v25  ;;  %v2100_v34 = vadd.f32 %v2074_v62, %v654_v32 }
 0x106   : > { %v721_v35 = vsub.f32 0.0, %v2093_v30  ;;  %v774_v38 = vmul.f32 1.442695, %v720_v29 }
 0x107   : > { %v770_v36 = vmul.f32 1.442695, %v718_v33  ;;  %v719_v37 = vsub.f32 0.0, %v2100_v34  ;;  %v1551_v39 = vpop.f32.mrb[4].mxu0 }
 0x108   : > { %v776_v40 = vmul.f32 1.442695, %v721_v35  ;;  %v2105_v41 = vadd.f32 %v1551_v39, %v2074_v62  ;;  %v587_v43 = vpop.f32.mrb[5].mxu0 }
 0x109   : > { %v1571_v42 = vpop.f32.mrb[4].mxu1  ;;  %v772_v44 = vmul.f32 1.442695, %v719_v37  ;;  %v2111_v46 = vadd.f32 %v2074_v62, %v587_v43  ;;  %v1552_v48 = vpop.f32.mrb[6].mxu0  ;;  %1619 = vpow2.f32 %v770_v36 }
 0x10a   : > { %v2108_v45 = vadd.f32 %v1571_v42, %v2074_v62  ;;  %v667_v47 = vpop.f32.mrb[5].mxu1  ;;  %v2117_v52 = vadd.f32 %v1552_v48, %v2074_v62  ;;  %v590_v54 = vpop.f32.mrb[7].mxu0  ;;  %1621 = vpow2.f32 %v774_v38 }
 0x10b   : > { %v2114_v51 = vadd.f32 %v2074_v62, %v667_v47  ;;  %v1572_v53 = vpop.f32.mrb[6].mxu1  ;;  %1623 = vpow2.f32 %v776_v40  ;;  %v2122_v61 = vadd.f32 %v2074_v62, %v590_v54 }
 0x10c   : > { %v724_v55 = vsub.f32 0.0, %v2108_v45  ;;  %v670_v57 = vpop.f32.mrb[7].mxu1  ;;  %1625 = vpow2.f32 %v772_v44  ;;  %v2125_v8 = vadd.f32 %v1572_v53, %v2074_v62 }
 0x10d   : > { %v722_v58 = vsub.f32 0.0, %v2114_v51  ;;  %v2128_v11 = vadd.f32 %v2074_v62, %v670_v57 }
 0x10e   : > { %v782_v59 = vmul.f32 1.442695, %v724_v55  ;;  %v725_v50 = vsub.f32 0.0, %v2125_v8 }
 0x10f   : > { %v778_v60 = vmul.f32 1.442695, %v722_v58  ;;  %v1555_v63 = vpop.f32.mrb[8].mxu0  ;;  %v723_v29 = vsub.f32 0.0, %v2128_v11 }
 0x110   : > { %1627 = vpow2.f32 %v782_v59  ;;  %v603_v1 = vpop.f32.mrb[9].mxu0  ;;  %v2131_v14 = vadd.f32 %v1555_v63, %v2074_v62  ;;  %v784_v42 = vmul.f32 1.442695, %v725_v50 }
 0x111   : > { %v1575_v0 = vpop.f32.mrb[8].mxu1  ;;  %1629 = vpow2.f32 %v778_v60  ;;  %v1556_v3 = vpop.f32.mrb[10].mxu0  ;;  %v2140_v23 = vadd.f32 %v2074_v62, %v603_v1  ;;  %v780_v54 = vmul.f32 1.442695, %v723_v29 }
 0x112   : > { %v683_v2 = vpop.f32.mrb[9].mxu1  ;;  %v606_v5 = vpop.f32.mrb[11].mxu0  ;;  %v2135_v16 = vadd.f32 %v1575_v0, %v2074_v62  ;;  %v708_v38 = vsub.f32 0.0, %v2131_v14  ;;  %v2152_v39 = vadd.f32 %v1556_v3, %v2074_v62 }
 0x113   : > { %v1576_v4 = vpop.f32.mrb[10].mxu1  ;;  %v1620_v7 = vpop.eup %1619  ;;  %v2146_v32 = vadd.f32 %v2074_v62, %v683_v2  ;;  %v706_v48 = vsub.f32 0.0, %v2140_v23  ;;  %v2162_v53 = vadd.f32 %v2074_v62, %v606_v5 }
 0x114   : > { %v686_v6 = vpop.f32.mrb[11].mxu1  ;;  %v1622_v9 = vpop.eup %1621  ;;  %v814_v13 = vadd.f32 1.0, %v1620_v7  ;;  %v728_v43 = vsub.f32 0.0, %v2135_v16  ;;  %v2158_v44 = vadd.f32 %v1576_v4, %v2074_v62  ;;  %v750_v58 = vmul.f32 1.442695, %v708_v38 }
 0x115   : > { %v1624_v10 = vpop.eup %1623  ;;  %v816_v49 = vadd.f32 1.0, %v1622_v9  ;;  %v726_v55 = vsub.f32 0.0, %v2146_v32  ;;  %v2166_v57 = vadd.f32 %v2074_v62, %v686_v6  ;;  %v709_v59 = vsub.f32 0.0, %v2152_v39 }
 0x116   : > { %v1626_v12 = vpop.eup %1625  ;;  %v817_v20 = vadd.f32 1.0, %v1624_v10  ;;  %1631 = vrcp.f32 %v814_v13  ;;  %v790_v0 = vmul.f32 1.442695, %v728_v43  ;;  %v729_v1 = vsub.f32 0.0, %v2158_v44 }
 0x117   : > { %v1559_v15 = vpop.f32.mrb[12].mxu0  ;;  %v815_v28 = vadd.f32 1.0, %v1626_v12  ;;  %1633 = vrcp.f32 %v816_v49  ;;  %v746_v5 = vmul.f32 1.442695, %v706_v48  ;;  %v707_v6 = vsub.f32 0.0, %v2162_v53 }
 0x118   : > { %v619_v56 = vpop.f32.mrb[13].mxu0  ;;  %1635 = vrcp.f32 %v817_v20  ;;  %v2170_v60 = vadd.f32 %v1559_v15, %v2074_v62  ;;  %v786_v10 = vmul.f32 1.442695, %v726_v55  ;;  %v727_v12 = vsub.f32 0.0, %v2166_v57 }
 0x119   : > { %v2137_v17 = vpop.f32.mrb[12].mxu1  ;;  %v1560_v24 = vpop.f32.mrb[14].mxu0  ;;  %1637 = vrcp.f32 %v815_v28  ;;  %v2174_v2 = vadd.f32 %v2074_v62, %v619_v56  ;;  %v752_v49 = vmul.f32 1.442695, %v709_v59  ;;  %v748_v29 = vmul.f32 1.442695, %v707_v6 }
 0x11a   : > { %v1628_v19 = vpop.eup %1627  ;;  %v2142_v27 = vpop.f32.mrb[13].mxu1  ;;  %v712_v50 = vsub.f32 0.0, %v2170_v60  ;;  %v788_v38 = vmul.f32 1.442695, %v727_v12 }
 0x11b   : > { %v622_v33 = vpop.f32.mrb[15].mxu0  ;;  %v2148_v35 = vpop.f32.mrb[14].mxu1  ;;  %v820_v37 = vadd.f32 1.0, %v1628_v19  ;;  %v792_v19 = vmul.f32 1.442695, %v729_v1  ;;  %v710_v20 = vsub.f32 0.0, %v2174_v2 }
 0x11c   : > { %v1630_v36 = vpop.eup %1629  ;;  %v2154_v40 = vpop.f32.mrb[15].mxu1 }
 0x11d   : > { %v818_v47 = vadd.f32 1.0, %v1630_v36  ;;  %1639 = vrcp.f32 %v820_v37  ;;  %v2193_v36 = vadd.f32 %v1560_v24, %v2074_v62  ;;  %v754_v55 = vmul.f32 1.442695, %v710_v20 }
 0x11e   : > { %1641 = vpow2.f32 %v784_v42  ;;  %v2196_v42 = vadd.f32 %v2074_v62, %v622_v33 }
 0x11f   : > { %v1563_v63 = vpop.f32.mrb[16].mxu0  ;;  %1643 = vrcp.f32 %v818_v47  ;;  %v758_v47 = vmul.f32 1.442695, %v712_v50  ;;  %v713_v59 = vsub.f32 0.0, %v2193_v36 }
 0x120   : > { %v635_v3 = vpop.f32.mrb[17].mxu0  ;;  %1645 = vpow2.f32 %v780_v54  ;;  %v1632_v28 = vpop.eup %1631  ;;  %v2201_v24 = vadd.f32 %v1563_v63, %v2074_v62  ;;  %v711_v33 = vsub.f32 0.0, %v2196_v42 }
 0x121   : > { %v2176_v4 = vpop.f32.mrb[16].mxu1  ;;  %v2179_v7 = vpop.f32.mrb[18].mxu0  ;;  %1647 = vpow2.f32 %v750_v58  ;;  %v878_v54 = vmul.f32 %v1632_v28, %v2086_v25  ;;  %v2208_v12 = vadd.f32 %v2074_v62, %v635_v3 }
 0x122   : > { %v2181_v9 = vpop.f32.mrb[17].mxu1  ;;  %v2184_v13 = vpop.f32.mrb[19].mxu0  ;;  %1649 = vpow2.f32 %v790_v0  ;;  %v716_v20 = vsub.f32 0.0, %v2201_v24 }
 0x123   : > { %v2186_v15 = vpop.f32.mrb[18].mxu1  ;;  %1651 = vpow2.f32 %v746_v5  ;;  %v1634_v37 = vpop.eup %1633 }
 0x124   : > { %v2189_v56 = vpop.f32.mrb[19].mxu1  ;;  %1653 = vpow2.f32 %v786_v10  ;;  %v1636_v43 = vpop.eup %1635  ;;  %v1509_v10 = vpack.c.bf16 %v878_v54, %v878_v54 }
 0x125   : > { %1655 = vpow2.f32 %v752_v49  ;;  %v1638_v48 = vpop.eup %1637  ;;  %v880_v49 = vmul.f32 %v1634_v37, %v2080_v21 }
 0x126   : > { %1657 = vpow2.f32 %v792_v19  ;;  %v2205_v5 = vmul.f32 %v1638_v48, %v2100_v34  ;;  %v2211_v19 = vmul.f32 1.442695, %v713_v59  ;;  %v714_v59 = vsub.f32 0.0, %v2208_v12 }
 0x127   : > { %v1640_v58 = vpop.eup %1639  ;;  %1659 = vpow2.f32 %v748_v29  ;;  %v2214_v29 = vmul.f32 1.442695, %v711_v33 }
 0x128   : > { %v1642_v0 = vpop.eup %1641  ;;  %1661 = vpow2.f32 %v788_v38  ;;  %v1511_v38 = vpack.c.bf16 %v880_v49, %v880_v49  ;;  %v1510_v3 = vpack.c.bf16 %v2205_v5, %v2205_v5  ;;  %v884_v21 = vmul.f32 %v1640_v58, %v2108_v45 }
 0x129   : > { %v1644_v1 = vpop.eup %1643  ;;  %v821_v6 = vadd.f32 1.0, %v1642_v0  ;;  %1663 = vpow2.f32 %v758_v47  ;;  %v881_v47 = vmul.f32 %v1636_v43, %v2093_v30  ;;  %v2225_v30 = vld [vmem:[%s2469_s2] ss:$0 sm:$0xff]  ;;  %v766_v45 = vmul.f32 1.442695, %v716_v20 }
 0x12a   : > { %v1646_v25 = vpop.eup %1645  ;;  %1665 = vpow2.f32 %v754_v55  ;;  %1006 = vrot.lane.b32.xlu0 %v1511_v38, %s1803_s21  ;;  %v2229_v58 = vadd.f32 %v2179_v7, %v2074_v62  ;;  %v2234_v49 = vadd.f32 %v2074_v62, %v2184_v13  ;;  %v2239_v20 = vadd.f32 %v2137_v17, %v2225_v30 }
 0x12b   : > { %v1648_v63 = vpop.eup %1647  ;;  %1667 = vrcp.f32 %v821_v6  ;;  %v819_v50 = vadd.f32 1.0, %v1646_v25  ;;  %v1512_v0 = vpack.c.bf16 %v881_v47, %v881_v47  ;;  %v882_v6 = vmul.f32 %v1644_v1, %v2114_v51 }
 0x12c   : > { %v1650_v28 = vpop.eup %1649  ;;  %v804_v34 = vadd.f32 1.0, %v1648_v63  ;;  %v762_v51 = vmul.f32 1.442695, %v714_v59  ;;  %v2244_v62 = vadd.f32 %v2225_v30, %v2142_v27  ;;  %v717_v38 = vsub.f32 0.0, %v2229_v58 }
 0x12d   : > { %v1652_v48 = vpop.eup %1651  ;;  %1669 = vrcp.f32 %v819_v50  ;;  %v824_v37 = vadd.f32 1.0, %v1650_v28  ;;  %1008 = vrot.lane.b32.xlu1 %v1512_v0, %s1803_s21  ;;  %v1515_v50 = vpack.c.bf16 %v884_v21, %v884_v21  ;;  %v2249_v47 = vadd.f32 %v2148_v35, %v2225_v30 }
 0x12e   : > { %v1654_v54 = vpop.eup %1653  ;;  %1671 = vrcp.f32 %v804_v34  ;;  %v802_v55 = vadd.f32 1.0, %v1652_v48  ;;  %1002 = vrot.lane.b32.xlu0 %v1509_v10, %s1803_s21  ;;  %v1513_v48 = vpack.c.bf16 %v882_v6, %v882_v6  ;;  %v1258_v59 = vsub.f32 0.0, %v2244_v62 }
 0x12f   : > { %v1656_v43 = vpop.eup %1655  ;;  %1673 = vrcp.f32 %v824_v37  ;;  %v822_v33 = vadd.f32 1.0, %v1654_v54  ;;  %v715_v37 = vsub.f32 0.0, %v2234_v49  ;;  %v1260_v54 = vsub.f32 0.0, %v2239_v20 }
 0x130   : > { %v1658_v5 = vpop.eup %1657  ;;  %1675 = vrcp.f32 %v802_v55  ;;  %v805_v25 = vadd.f32 1.0, %v1656_v43  ;;  %v2256_v55 = vadd.f32 %v2225_v30, %v2154_v40  ;;  %v768_v43 = vmul.f32 1.442695, %v717_v38 }
 0x131   : > { %v1660_v63 = vpop.eup %1659  ;;  %1677 = vrcp.f32 %v822_v33  ;;  %v825_v28 = vadd.f32 1.0, %v1658_v5  ;;  %1004 = vrot.lane.b32.xlu1 %v1510_v3, %s1803_s21  ;;  %v2263_v3 = vadd.f32 %v2176_v4, %v2225_v30  ;;  %v1261_v33 = vsub.f32 0.0, %v2249_v47 }
 0x132   : > { %v1662_v7 = vpop.eup %1661  ;;  %1679 = vrcp.f32 %v805_v25  ;;  %v803_v34 = vadd.f32 1.0, %v1660_v63  ;;  %1022 = vrot.lane.b32.xlu0 %v1515_v50, %s1804_s29  ;;  %v2268_v40 = vadd.f32 %v2225_v30, %v2181_v9  ;;  %v2274_v25 = vadd.f32 %v2186_v15, %v2225_v30 }
 0x133   : > { %v1664_v13 = vpop.eup %1663  ;;  %1681 = vrcp.f32 %v825_v28  ;;  %v823_v1 = vadd.f32 1.0, %v1662_v7  ;;  %v764_v63 = vmul.f32 1.442695, %v715_v37  ;;  %v1259_v50 = vsub.f32 0.0, %v2256_v55 }
 0x134   : > { %v1666_v17 = vpop.eup %1665  ;;  %1683 = vrcp.f32 %v803_v34  ;;  %v808_v21 = vadd.f32 1.0, %v1664_v13  ;;  %v1266_v9 = vmul.f32 1.442695, %v1258_v59  ;;  %v1272_v34 = vmul.f32 1.442695, %v1261_v33 }
 0x135   : > { %v1668_v10 = vpop.eup %1667  ;;  %1685 = vrcp.f32 %v823_v1  ;;  %v806_v27 = vadd.f32 1.0, %v1666_v17  ;;  %v1268_v37 = vmul.f32 1.442695, %v1259_v50 }
 0x136   : > { %v885_v35 = vmul.f32 %v1668_v10, %v2125_v8  ;;  %1687 = vrcp.f32 %v808_v21  ;;  %1018 = vrot.lane.b32.xlu0 %v1513_v48, %s1804_s29 }
 0x137   : > { %v1670_v0 = vpop.eup %1669  ;;  %1689 = vrcp.f32 %v806_v27 }
 0x138   : > { %v1672_v8 = vpop.eup %1671  ;;  %v1516_v5 = vpack.c.bf16 %v885_v35, %v885_v35  ;;  %v883_v6 = vmul.f32 %v1670_v0, %v2128_v11  ;;  %1691 = vpow2.f32 %v2211_v19  ;;  %v1270_v11 = vmul.f32 1.442695, %v1260_v54 }
 0x139   : > { %v2276_v4 = vpop.eup %1673  ;;  %1693 = vpow2.f32 %v2214_v29  ;;  %v1264_v19 = vsub.f32 0.0, %v2263_v3  ;;  %v1262_v29 = vsub.f32 0.0, %v2268_v40  ;;  %v868_v38 = vmul.f32 %v1672_v8, %v2131_v14 }
 0x13a   : > { %v1676_v28 = vpop.eup %1675  ;;  %1695 = vpow2.f32 %v766_v45  ;;  %1024 = vrot.lane.b32.xlu1 %v1516_v5, %s1804_s29  ;;  %v1514_v1 = vpack.c.bf16 %v883_v6, %v883_v6  ;;  %v1265_v45 = vsub.f32 0.0, %v2274_v25 }
 0x13b   : > { %v1678_v7 = vpop.eup %1677  ;;  %v866_v15 = vmul.f32 %v1676_v28, %v2140_v23  ;;  %1697 = vpow2.f32 %v762_v51  ;;  %v1278_v23 = vmul.f32 1.442695, %v1264_v19  ;;  %v1274_v14 = vmul.f32 1.442695, %v1262_v29 }
 0x13c   : > { %v1680_v13 = vpop.eup %1679  ;;  %1699 = vpow2.f32 %v768_v43  ;;  %v886_v21 = vmul.f32 %v1678_v7, %v2146_v32  ;;  %v1499_v54 = vpack.c.bf16 %v868_v38, %v868_v38  ;;  %v1280_v59 = vmul.f32 1.442695, %v1265_v45 }
 0x13d   : > { %v2287_v17 = vpop.eup %1681  ;;  %v1497_v48 = vpack.c.bf16 %v866_v15, %v866_v15  ;;  %1701 = vpow2.f32 %v764_v63  ;;  %v869_v35 = vmul.f32 %v1680_v13, %v2152_v39  ;;  %v2301_v15 = vadd.f32 %v2225_v30, %v2189_v56 }
 0x13e   : > { %v1684_v10 = vpop.eup %1683  ;;  %1020 = vrot.lane.b32.xlu1 %v1514_v1, %s1804_s29  ;;  %1703 = vpow2.f32 %v1270_v11  ;;  %v1517_v0 = vpack.c.bf16 %v886_v21, %v886_v21 }
 0x13f   : > { %v1686_v51 = vpop.eup %1685  ;;  %970 = vrot.lane.b32.xlu0 %v1497_v48, %s1805_s30  ;;  %1705 = vpow2.f32 %v1266_v9  ;;  %v867_v43 = vmul.f32 %v1684_v10, %v2162_v53  ;;  %v1500_v63 = vpack.c.bf16 %v869_v35, %v869_v35  ;;  %v1263_v30 = vsub.f32 0.0, %v2301_v15 }
 0x140   : > { %v1688_v27 = vpop.eup %1687  ;;  %1707 = vpow2.f32 %v1272_v34  ;;  %v887_v39 = vmul.f32 %v1686_v51, %v2166_v57 }
 0x141   : > { %v1690_v32 = vpop.eup %1689  ;;  %1709 = vpow2.f32 %v1268_v37  ;;  %v1498_v11 = vpack.c.bf16 %v867_v43, %v867_v43  ;;  %v872_v53 = vmul.f32 %v1688_v27, %v2170_v60 }
 0x142   : > { %v1692_v33 = vpop.eup %1691  ;;  %974 = vrot.lane.b32.xlu1 %v1499_v54, %s1805_s30  ;;  %1711 = vpow2.f32 %v1278_v23  ;;  %v1518_v13 = vpack.c.bf16 %v887_v39, %v887_v39  ;;  %v870_v45 = vmul.f32 %v1690_v32, %v2174_v2 }
 0x143   : > { %v1694_v8 = vpop.eup %1693  ;;  %v809_v5 = vadd.f32 1.0, %v1692_v33  ;;  %1026 = vrot.lane.b32.xlu0 %v1517_v0, %s1804_s29  ;;  %1713 = vpow2.f32 %v1274_v14  ;;  %v1503_v38 = vpack.c.bf16 %v872_v53, %v872_v53 }
 0x144   : > { %v1696_v6 = vpop.eup %1695  ;;  %v807_v50 = vadd.f32 1.0, %v1694_v8  ;;  %1715 = vpow2.f32 %v1280_v59  ;;  %v1501_v14 = vpack.c.bf16 %v870_v45, %v870_v45  ;;  %v1276_v59 = vmul.f32 1.442695, %v1263_v30 }
 0x145   : > { %v1698_v28 = vpop.eup %1697  ;;  %1717 = vrcp.f32 %v809_v5  ;;  %v812_v9 = vadd.f32 1.0, %v1696_v6 }
 0x146   : > { %v1700_v19 = vpop.eup %1699  ;;  %1719 = vrcp.f32 %v807_v50  ;;  %v810_v7 = vadd.f32 1.0, %v1698_v28  ;;  %976 = vrot.lane.b32.xlu1 %v1500_v63, %s1805_s30 }
 0x147   : > { %v1702_v34 = vpop.eup %1701  ;;  %1721 = vrcp.f32 %v812_v9  ;;  %v813_v57 = vadd.f32 1.0, %v1700_v19  ;;  %972 = vrot.lane.b32.xlu0 %v1498_v11, %s1805_s30 }
 0x148   : > { %v1704_v29 = vpop.eup %1703  ;;  %1723 = vrcp.f32 %v810_v7  ;;  %v811_v60 = vadd.f32 1.0, %v1702_v34 }
 0x149   : > { %v1706_v1 = vpop.eup %1705  ;;  %1725 = vrcp.f32 %v813_v57  ;;  %v1284_v48 = vadd.f32 1.0, %v1704_v29  ;;  %v888_v57 = vmul.f32 %v2276_v4, %v2135_v16 }
 0x14a   : > { %v1708_v21 = vpop.eup %1707  ;;  %1727 = vrcp.f32 %v811_v60  ;;  %1028 = vrot.lane.b32.xlu1 %v1518_v13, %s1804_s29  ;;  %v1282_v56 = vadd.f32 1.0, %v1706_v1 }
 0x14b   : > { %v1710_v37 = vpop.eup %1709  ;;  %982 = vrot.lane.b32.xlu0 %v1503_v38, %s1805_s30  ;;  %1729 = vrcp.f32 %v1284_v48  ;;  %v1285_v10 = vadd.f32 1.0, %v1708_v21 }
 0x14c   : > { %v1712_v23 = vpop.eup %1711  ;;  %1731 = vrcp.f32 %v1282_v56  ;;  %v1283_v2 = vadd.f32 1.0, %v1710_v37  ;;  %v1519_v56 = vpack.c.bf16 %v888_v57, %v888_v57 }
 0x14d   : > { %v1714_v51 = vpop.eup %1713  ;;  %1733 = vrcp.f32 %v1285_v10  ;;  %v1288_v27 = vadd.f32 1.0, %v1712_v23  ;;  %v889_v10 = vmul.f32 %v2287_v17, %v2158_v44  ;;  %v702_v17 = vsub.f32 0.0, %v2111_v46 }
 0x14e   : > { %v1716_v54 = vpop.eup %1715  ;;  %1735 = vrcp.f32 %v1283_v2  ;;  %v1286_v35 = vadd.f32 1.0, %v1714_v51 }
 0x14f   : > { %v1718_v32 = vpop.eup %1717  ;;  %978 = vrot.lane.b32.xlu0 %v1501_v14, %s1805_s30  ;;  %1737 = vrcp.f32 %v1288_v27  ;;  %v1289_v0 = vadd.f32 1.0, %v1716_v54  ;;  %v738_v14 = vmul.f32 1.442695, %v702_v17  ;;  %v700_v27 = vsub.f32 0.0, %v2077_v18 }
 0x150   : > { %v1720_v43 = vpop.eup %1719  ;;  %v873_v33 = vmul.f32 %v1718_v32, %v2193_v36  ;;  %1739 = vrcp.f32 %v1286_v35  ;;  %v703_v54 = vsub.f32 0.0, %v2122_v61 }
 0x151   : > { %v1722_v8 = vpop.eup %1721  ;;  %1741 = vrcp.f32 %v1289_v0  ;;  %v871_v63 = vmul.f32 %v1720_v43, %v2196_v42  ;;  %v734_v35 = vmul.f32 1.442695, %v700_v27  ;;  %v704_v0 = vsub.f32 0.0, %v2105_v41 }
 0x152   : > { %v1724_v5 = vpop.eup %1723  ;;  %v1504_v6 = vpack.c.bf16 %v873_v33, %v873_v33  ;;  %v876_v39 = vmul.f32 %v1722_v8, %v2201_v24  ;;  %1743 = vpow2.f32 %v1276_v59  ;;  %v698_v59 = vsub.f32 0.0, %v2083_v22 }
 0x153   : > { %v1726_v50 = vpop.eup %1725  ;;  %v874_v36 = vmul.f32 %v1724_v5, %v2208_v12  ;;  %v1502_v19 = vpack.c.bf16 %v871_v63, %v871_v63  ;;  %v740_v33 = vmul.f32 1.442695, %v703_v54  ;;  %v742_v63 = vmul.f32 1.442695, %v704_v0 }
 0x154   : > { %v1728_v28 = vpop.eup %1727  ;;  %v1507_v11 = vpack.c.bf16 %v876_v39, %v876_v39  ;;  %984 = vrot.lane.b32.xlu1 %v1504_v6, %s1805_s30  ;;  %v877_v7 = vmul.f32 %v1726_v50, %v2229_v58  ;;  %v730_v8 = vmul.f32 1.442695, %v698_v59  ;;  %v699_v6 = vsub.f32 0.0, %v2096_v31 }
 0x155   : > { %v1730_v53 = vpop.eup %1729  ;;  %v1505_v58 = vpack.c.bf16 %v874_v36, %v874_v36  ;;  %v705_v50 = vsub.f32 0.0, %v2117_v52 }
 0x156   : > { %v1732_v9 = vpop.eup %1731  ;;  %998 = vrot.lane.b32.xlu0 %v1507_v11, %s1803_s21  ;;  %v1300_v42 = vmul.f32 %v1730_v53, %v2239_v20  ;;  %v1508_v45 = vpack.c.bf16 %v877_v7, %v877_v7  ;;  %v732_v53 = vmul.f32 1.442695, %v699_v6 }
 0x157   : > { %v1734_v34 = vpop.eup %1733  ;;  %v1298_v24 = vmul.f32 %v1732_v9, %v2244_v62  ;;  %v875_v62 = vmul.f32 %v1728_v28, %v2234_v49  ;;  %v744_v9 = vmul.f32 1.442695, %v705_v50 }
 0x158   : > { %v1736_v12 = vpop.eup %1735  ;;  %980 = vrot.lane.b32.xlu1 %v1502_v19, %s1805_s30  ;;  %v1308_v20 = vpack.c.bf16 %v1300_v42, %v1300_v42  ;;  %v1301_v29 = vmul.f32 %v1734_v34, %v2249_v47 }
 0x159   : > { %v1738_v13 = vpop.eup %1737  ;;  %v1306_v60 = vpack.c.bf16 %v1298_v24, %v1298_v24  ;;  %v1299_v1 = vmul.f32 %v1736_v12, %v2256_v55  ;;  %v1506_v23 = vpack.c.bf16 %v875_v62, %v875_v62 }
 0x15a   : > { %v1740_v38 = vpop.eup %1739  ;;  %994 = vrot.lane.b32.xlu0 %v1505_v58, %s1803_s21  ;;  %1317 = vst.msk [vmem:[%s2328_s9 + $0x8] sm:$0xf] %vm1314_vm2, %v1308_v20  ;;  %v1309_v16 = vpack.c.bf16 %v1301_v29, %v1301_v29  ;;  %v1304_v4 = vmul.f32 %v1738_v13, %v2263_v3 }
 0x15b   : > { %v1742_v48 = vpop.eup %1741  ;;  %1315 = vst.msk [vmem:[%s2328_s9] sm:$0xf] %vm1314_vm2, %v1306_v60  ;;  %v1307_v47 = vpack.c.bf16 %v1299_v1, %v1299_v1  ;;  %v1302_v55 = vmul.f32 %v1740_v38, %v2268_v40 }
 0x15c   : > { %v1744_v21 = vpop.eup %1743  ;;  %1000 = vrot.lane.b32.xlu1 %v1508_v45, %s1803_s21  ;;  %1318 = vst.msk [vmem:[%s2328_s9 + $0xc] sm:$0xf] %vm1314_vm2, %v1309_v16  ;;  %v1312_v49 = vpack.c.bf16 %v1304_v4, %v1304_v4  ;;  %v1305_v30 = vmul.f32 %v1742_v48, %v2274_v25  ;;  %v1520_v25 = vpack.c.bf16 %v889_v10, %v889_v10 }
 0x15d   : > { %1316 = vst.msk [vmem:[%s2328_s9 + $0x4] sm:$0xf] %vm1314_vm2, %v1307_v47  ;;  %v1310_v3 = vpack.c.bf16 %v1302_v55, %v1302_v55  ;;  %v1287_v37 = vadd.f32 1.0, %v1744_v21 }
 0x15e   : > { %1030 = vrot.lane.b32.xlu0 %v1519_v56, %s1804_s29  ;;  %1321 = vst.msk [vmem:[%s2328_s9 + $0x18] sm:$0xf] %vm1314_vm2, %v1312_v49  ;;  %v1313_v40 = vpack.c.bf16 %v1305_v30, %v1305_v30 }
 0x15f   : > { %1319 = vst.msk [vmem:[%s2328_s9 + $0x10] sm:$0xf] %vm1314_vm2, %v1310_v3  ;;  %1745 = vrcp.f32 %v1287_v37 }
 0x160   : > { %996 = vrot.lane.b32.xlu1 %v1506_v23, %s1803_s21  ;;  %1322 = vst.msk [vmem:[%s2328_s9 + $0x1c] sm:$0xf] %vm1314_vm2, %v1313_v40  ;;  %1747 = vpow2.f32 %v738_v14 }
 0x161   : > { %1749 = vpow2.f32 %v734_v35 }
 0x162   : > { %1751 = vpow2.f32 %v740_v33 }
 0x163   : > { %1753 = vpow2.f32 %v730_v8 }
 0x164   : > { %1032 = vrot.lane.b32.xlu1 %v1520_v25, %s1804_s29  ;;  %1755 = vpow2.f32 %v742_v63 }
 0x169   : > { %v1746_v2 = vpop.eup %1745 }
 0x16a   : > { %v1303_v51 = vmul.f32 %v1746_v2, %v2301_v15  ;;  %v701_v15 = vsub.f32 0.0, %v2089_v26  ;;  %v1748_v11 = vpop.eup %1747 }
 0x16b   : > { %v798_v19 = vadd.f32 1.0, %v1748_v11  ;;  %v1750_v34 = vpop.eup %1749 }
 0x16c   : > { %v1311_v44 = vpack.c.bf16 %v1303_v51, %v1303_v51  ;;  %v736_v39 = vmul.f32 1.442695, %v701_v15  ;;  %v1752_v12 = vpop.eup %1751  ;;  %v796_v57 = vadd.f32 1.0, %v1750_v34 }
 0x16d   : > { %v1754_v20 = vpop.eup %1753  ;;  %v799_v60 = vadd.f32 1.0, %v1752_v12 }
 0x16e   : > { %1320 = vst.msk [vmem:[%s2328_s9 + $0x14] sm:$0xf] %vm1314_vm2, %v1311_v44  ;;  %1757 = vpow2.f32 %v736_v39  ;;  %v1756_v29 = vpop.eup %1755  ;;  %v794_v38 = vadd.f32 1.0, %v1754_v20 }
 0x16f   : > { %1759 = vpow2.f32 %v732_v53  ;;  %v800_v62 = vadd.f32 1.0, %v1756_v29 }
 0x170   : > { %1761 = vpow2.f32 %v744_v9 }
 0x171   : > { %1763 = vrcp.f32 %v798_v19 }
 0x172   : > { %1765 = vrcp.f32 %v796_v57 }
 0x173   : > { %1767 = vrcp.f32 %v799_v60 }
 0x174   : > { %1769 = vrcp.f32 %v794_v38 }
 0x175   : > { %1771 = vrcp.f32 %v800_v62 }
 0x178   : > { %v1758_v13 = vpop.eup %1757 }
 0x179   : > { %v1760_v16 = vpop.eup %1759  ;;  %v797_v4 = vadd.f32 1.0, %v1758_v13 }
 0x17a   : > { %v1762_v48 = vpop.eup %1761  ;;  %v795_v56 = vadd.f32 1.0, %v1760_v16 }
 0x17b   : > { %v1764_v47 = vpop.eup %1763  ;;  %1773 = vrcp.f32 %v797_v4  ;;  %v801_v30 = vadd.f32 1.0, %v1762_v48 }
 0x17c   : > { %v862_v49 = vmul.f32 %v1764_v47, %v2111_v46  ;;  %v1766_v37 = vpop.eup %1765  ;;  %1775 = vrcp.f32 %v795_v56 }
 0x17d   : > { %1777 = vrcp.f32 %v801_v30  ;;  %v1768_v25 = vpop.eup %1767  ;;  %v860_v2 = vmul.f32 %v1766_v37, %v2077_v18 }
 0x17e   : > { %v1493_v10 = vpack.c.bf16 %v862_v49, %v862_v49  ;;  %v1770_v51 = vpop.eup %1769  ;;  %v863_v18 = vmul.f32 %v1768_v25, %v2122_v61 }
 0x17f   : > { %v1772_v17 = vpop.eup %1771  ;;  %v1491_v54 = vpack.c.bf16 %v860_v2, %v860_v2  ;;  %v858_v35 = vmul.f32 %v1770_v51, %v2083_v22 }
 0x180   : > { %v864_v0 = vmul.f32 %v1772_v17, %v2105_v41  ;;  %v1494_v6 = vpack.c.bf16 %v863_v18, %v863_v18 }
 0x181   : > { %v1489_v61 = vpack.c.bf16 %v858_v35, %v858_v35 }
 0x182   : > { %v1495_v22 = vpack.c.bf16 %v864_v0, %v864_v0 }
 0x185   : > { %v1774_v27 = vpop.eup %1773 }
 0x186   : > { %v861_v15 = vmul.f32 %v1774_v27, %v2089_v26 }
 0x188   : > { %v1492_v26 = vpack.c.bf16 %v861_v15, %v861_v15 }
 0x19c   : > { %v2368_v32 = vpop.permute.xlu0 %1006 }
 0x19f   : > { %v2372_v43 = vpop.permute.xlu1 %1008 }
 0x1a0   : > { %v2374_v5 = vpop.permute.xlu0 %1002 }
 0x1a3   : > { %v2378_v28 = vpop.permute.xlu1 %1004 }
 0x1a4   : > { %v2380_v36 = vpop.permute.xlu0 %1022 }
 0x1a8   : > { %v2384_v42 = vpop.permute.xlu0 %1018 }
 0x1ac   : > { %v2382_v7 = vpop.permute.xlu1 %1024 }
 0x1b0   : > { %v2386_v24 = vpop.permute.xlu1 %1020 }
 0x1b1   : > { %v2388_v58 = vpop.permute.xlu0 %970 }
 0x1b2   : > { %v1037_v9 = vsel %vm1034_vm3, %v1489_v61, %v2388_v58 }
 0x1b4   : > { %v975_v1 = vpop.permute.xlu1 %974 }
 0x1b5   : > { %v1027_v45 = vpop.permute.xlu0 %1026  ;;  %v1043_v33 = vsel %vm1034_vm3, %v1491_v54, %v975_v1 }
 0x1b8   : > { %v977_v21 = vpop.permute.xlu1 %976 }
 0x1b9   : > { %v2390_v55 = vpop.permute.xlu0 %972  ;;  %v1046_v29 = vsel %vm1034_vm3, %v1492_v26, %v977_v21 }
 0x1bc   : > { %v1029_v23 = vpop.permute.xlu1 %1028 }
 0x1bd   : > { %v983_v3 = vpop.permute.xlu0 %982 }
 0x1c1   : > { %v979_v40 = vpop.permute.xlu0 %978 }
 0x1c2   : > { %v1049_v46 = vsel %vm1034_vm3, %v1493_v10, %v979_v40 }
 0x1c3   : > { %v1069_v44 = vsel %vm1059_vm5, %v1049_v46, %v2374_v5  ;;  %v1776_v5 = vpop.eup %1775 }
 0x1c4   : > { %v1090_v14 = vsel %vm1076_vm4, %v1069_v44, %v1027_v45  ;;  %v1778_v39 = vpop.eup %1777  ;;  %v859_v41 = vmul.f32 %v1776_v5, %v2096_v31 }
 0x1c5   : > { %1106 = vst.msk [vmem:[%s2399_s12 + $0x10] sm:$0xf] %vm1101_vm6, %v1090_v14  ;;  %v865_v12 = vmul.f32 %v1778_v39, %v2117_v52 }
 0x1c6   : > { %v985_v59 = vpop.permute.xlu1 %984  ;;  %v1490_v52 = vpack.c.bf16 %v859_v41, %v859_v41 }
 0x1c7   : > { %v1496_v38 = vpack.c.bf16 %v865_v12, %v865_v12 }
 0x1c8   : > { %v999_v8 = vpop.permute.xlu0 %998 }
 0x1c9   : > { %v1065_v63 = vsel %vm1059_vm5, %v1043_v33, %v999_v8  ;;  %v1058_v16 = vsel %vm1034_vm3, %v1496_v38, %v985_v59 }
 0x1ca   : > { %v981_v50 = vpop.permute.xlu1 %980  ;;  %v1084_v11 = vsel %vm1076_vm4, %v1065_v63, %v2380_v36  ;;  %v1055_v36 = vsel %vm1034_vm3, %v1495_v22, %v983_v3 }
 0x1cb   : > { %v1052_v53 = vsel %vm1034_vm3, %v1494_v6, %v981_v50  ;;  %1104 = vst.msk [vmem:[%s2399_s12 + $0x8] sm:$0xf] %vm1101_vm6, %v1084_v11  ;;  %v1073_v60 = vsel %vm1059_vm5, %v1055_v36, %v2368_v32  ;;  %v1075_v32 = vsel %vm1059_vm5, %v1058_v16, %v2372_v43 }
 0x1cc   : > { %v1071_v19 = vsel %vm1059_vm5, %v1052_v53, %v2378_v28  ;;  %v995_v34 = vpop.permute.xlu0 %994 }
 0x1cd   : > { %v1093_v57 = vsel %vm1076_vm4, %v1071_v19, %v1029_v23  ;;  %v1061_v20 = vsel %vm1059_vm5, %v1037_v9, %v995_v34 }
 0x1ce   : > { %1107 = vst.msk [vmem:[%s2399_s12 + $0x14] sm:$0xf] %vm1101_vm6, %v1093_v57  ;;  %v1001_v31 = vpop.permute.xlu1 %1000  ;;  %v1078_v58 = vsel %vm1076_vm4, %v1061_v20, %v2384_v42  ;;  %v1040_v42 = vsel %vm1034_vm3, %v1490_v52, %v2390_v55 }
 0x1cf   : > { %v1067_v28 = vsel %vm1059_vm5, %v1046_v29, %v1001_v31  ;;  %1102 = vst.msk [vmem:[%s2399_s12] sm:$0xf] %vm1101_vm6, %v1078_v58 }
 0x1d0   : > { %v1087_v13 = vsel %vm1076_vm4, %v1067_v28, %v2382_v7  ;;  %v1031_v1 = vpop.permute.xlu0 %1030 }
 0x1d1   : > { %1105 = vst.msk [vmem:[%s2399_s12 + $0xc] sm:$0xf] %vm1101_vm6, %v1087_v13  ;;  %v1096_v45 = vsel %vm1076_vm4, %v1073_v60, %v1031_v1 }
 0x1d2   : > { %v997_v62 = vpop.permute.xlu1 %996  ;;  %1108 = vst.msk [vmem:[%s2399_s12 + $0x18] sm:$0xf] %vm1101_vm6, %v1096_v45 }
 0x1d3   : > { %v1063_v7 = vsel %vm1059_vm5, %v1040_v42, %v997_v62 }
 0x1d4   : > { %v1081_v4 = vsel %vm1076_vm4, %v1063_v7, %v2386_v24 }
 0x1d5   : > { %1103 = vst.msk [vmem:[%s2399_s12 + $0x4] sm:$0xf] %vm1101_vm6, %v1081_v4 }
 0x1d6   : > { %v1033_v48 = vpop.permute.xlu1 %1032 }
 0x1d7   : > { %v1099_v47 = vsel %vm1076_vm4, %v1075_v32, %v1033_v48 }
 0x1d8   : > { %1109 = vst.msk [vmem:[%s2399_s12 + $0x1c] sm:$0xf] %vm1101_vm6, %v1099_v47 }
 0x1d9 PF: > { %p14_p9 = scmp.ge.s32.totalorder %s1858_s25, 4   ;;  %s2474_s21 = smov %s1797_s22 }
 0x1da   : > { %s2475_s22 = smov %s1867_s28  ;;  %s2476_s23 = smov %s1858_s25 }
 0x1db   :  { %16 = sbr.rel (!%p14_p9) target bundleno = 2 (0x2), region = 125 }

// kernel: transition_block_forward.3
= control target key start
LH: loop header
LB: loop body
LE: loop exit
PB: predicated region body
PF: predicated region fallthrough
CT: control target
= control target key end

     0   :  { %12 = vsyncpa [#allocation3], 0  ;;  %s2014_s0 = inlined_call_operand.vmem [shape: bf16[2,8,8,32], index: 0, kind: input, shape index: {}, may-alias: {0,1}]   ;;  %s2015_s1 = inlined_call_operand.vmem [shape: bf16[2,8,8,32], index: 1, kind: input, shape index: {}, may-alias: {0,1}]   ;;  %s2016_s2 = inlined_call_operand.vmem [shape: bf16[2,8,8,8], index: 2, kind: input, shape index: {}]   ;;  %s2017_s3 = inlined_call_operand.vmem [shape: bf16[32,8], index: 3, kind: input, shape index: {}]   ;;  %s2018_s4 = inlined_call_operand.vmem [shape: bf16[16,8], index: 4, kind: input, shape index: {}]   ;;  %s2019_s5 = inlined_call_operand.vmem [shape: bf16[24,8], index: 5, kind: input, shape index: {}]   ;;  %s2020_s6 = inlined_call_operand.vmem [shape: f32[1,8], index: 6, kind: input, shape index: {}]   ;;  %s2021_s7 = inlined_call_operand.hbm [shape: f32[2,8,8,16], index: 7, kind: output, shape index: {}]  }
   0x1   :  { %14 = vsyncpa [#allocation3 + $0x1], 0  ;;  %s1648_s1 = smov 0   ;;  %s1650_s24 = smov 0  }
   0x2   :  { %s1652_s25 = smov 0   ;;  %s1654_s26 = smov 0  }
   0x3   :  { %s1656_s27 = smov 0   ;;  %s1658_s28 = smov 0  }
   0x4 LB: > { %s1237_s29 = sadd.s32 4294967295, %s1598_s28   ;;  %s1238_s30 = sadd.s32 4294967294, %s1598_s28   ;;  %s1598_s28 = sphi %s1658_s28, %s20_s28   ;;  %s1594_s27 = sphi %s1656_s27, %s2030_s27   ;;  %s1590_s26 = sphi %s1654_s26, %s2029_s26   ;;  %s1586_s25 = sphi %s1652_s25, %s2028_s25   ;;  %s1582_s24 = sphi %s1650_s24, %s2027_s24   ;;  %s1578_s1 = sphi %s1648_s1, %s2026_s1  }
   0x5   : > { %s32_s8 = sadd.s32 1, %s1594_s27  ;;  %s217_s9 = sadd.s32 1, %s1586_s25 }
   0x6   : > { %p34_p0 = scmp.ge.s32.totalorder %s32_s8, 2  ;;  %p227_p1 = scmp.ne.s32.totalorder %s1586_s25, %s1582_s24 }
   0x7   : > { %p228_p2 = scmp.eq.s32.totalorder %s1237_s29, 1  ;;  %p233_p3 = scmp.ne.s32.totalorder %s1582_s24, %s1578_s1 }
   0x8   : > { %s2032_s8 = smov (%p34_p0, %s32_s8), 0  ;;  %p234_p5 = scmp.eq.s32.totalorder %s1238_s30, 1 }
   0x9   : > { %p1688_p4 = por %p228_p2, %p227_p1  ;;  %s212_s11 = ssub.s32 %s1594_s27, %s2032_s8 }
   0xa   : > { %p1241_p6 = scmp.ge.s32.totalorder %s1598_s28, 1  ;;  %p215_p7 = scmp.eq.s32.totalorder %s212_s11, 0 }
   0xb   : > { %p1695_p8 = por %p234_p5, %p233_p3  ;;  %p309_p9 = scmp.lt.s32.totalorder %s1598_s28, 3 }
   0xc   : > { %s1701_s13 = scalar_select %p215_p7, %s1586_s25, %s217_s9  }
   0xd   : > { %p310_p10 = pnand %p1241_p6, %p309_p9 }
   0xe   : > { %p367_p11 = scmp.lt.s32.totalorder (!%p310_p10), %s1590_s26, 1  ;;  %v1600_v3 = vmov (!%p310_p10), 0   ;;  %s1601_s19 = smov (!%p310_p10), 104   ;;  %v1480_v59 = vld [vmem:[%s2018_s4] sm:$0xff] (!%p310_p10)   ;;  %vm720_vm0 = vcmask (!%p310_p10), 1040384   ;;  %vm458_vm3 = vcmask (!%p310_p10), 130048  }
   0xf   : > { %313 = sbr.rel (%p310_p10) target bundleno = 571 (0x23b), region = 48  ;;  %v1276_v4 = vcombine.low (!%p310_p10), %v1600_v3, %v1600_v3  ;;  %s1602_s20 = smov (!%p310_p10), 112   ;;  %v1774_v62 = vld [vmem:[%s2017_s3] sm:$0xff] (!%p310_p10)   ;;  %1367 = vmatprep.subr.bf16.mxu1 (!%p310_p10), %v1480_v59  ;;  %1333 = vmatprep.subr.bf16.mxu0 (!%p310_p10), %v1480_v59  ;;  %vm721_vm1 = vsmask.f32 (!%p310_p10), 256  ;;  %vm902_vm4 = vcmask (!%p310_p10), 1043456  }
  0x10   : > { %s1603_s21 = smov (!%p310_p10), 120   ;;  %1368 = vmatpush3.bf16.msra.mxu1 (!%p310_p10), %v1480_v59  ;;  %1334 = vmatpush3.bf16.msra.mxu0 (!%p310_p10), %v1480_v59  ;;  %vm1782_vm2 = vmand (!%p310_p10), %vm720_vm0, %vm721_vm1  ;;  %s1604_s16 = smov (!%p310_p10), 8   ;;  %vm554_vm5 = vcmask (!%p310_p10), 261120   ;;  %vm816_vm6 = vcmask (!%p310_p10), 64512   ;;  %vm889_vm7 = vcmask (!%p310_p10), 195584  }
  0x11   : > { %v765_v20 = vshrl.u32 (!%p310_p10), %v1276_v4, 16  ;;  %v768_v33 = vshll.u32 (!%p310_p10), %v1276_v4, 16  ;;  %1343 = vmatprep.subr.bf16.mxu1 (!%p310_p10), %v1774_v62  ;;  %s1605_s17 = smov (!%p310_p10), 16   ;;  %s363_s30 = sand.u32 (!%p310_p10), 1, %s1582_s24  }
  0x12   : > { %s1242_s9 = sshll.u32 (!%p310_p10), %s363_s30, 6  ;;  %s1606_s23 = smov (!%p310_p10), [#allocation2]  }
  0x13   : > { %v767_v34 = vrot.slane (!%p310_p10), %v765_v20, 7  ;;  %s1927_s11 = scalar_lea.vmem (!%p310_p10), [#allocation2], %s1242_s9 }
  0x15   : > { %v770_v43 = vor.u32 (!%p310_p10), %v768_v33, %v767_v34  ;;  %v1482_v33 = vld [vmem:[%s2017_s3 + $0x8] sm:$0xff] (!%p310_p10)  }
  0x16   : > { %s1705_s14 = scalar_select %p367_p11, %s1590_s26, 1 }
  0x18   : > { %s1293_s15 = sshll.u32 %s1705_s14, 5 }
  0x19   : > { %s1713_s18 = scalar_lea.vmem %s2014_s0, %s1293_s15  ;;  %s400_s29 = scalar_lea.vmem %s2016_s2, %s1293_s15 }
  0x1a   : > { %v1716_v0 = vld [vmem:[%s1713_s18] sm:$0xf]  ;;  %v1719_v1 = vld [vmem:[%s1713_s18 + $0x8] sm:$0xf]  ;;  %v1722_v2 = vld [vmem:[%s1713_s18 + $0xc] sm:$0xf] }
  0x1b   : > { %v1268_v5 = vcombine.low %v1716_v0, %v1716_v0  ;;  %v1270_v6 = vcombine.low %v1719_v1, %v1719_v1  ;;  %v1259_v7 = vcombine.low %v1719_v1, %v1722_v2  ;;  %v1731_v8 = vld [vmem:[%s1713_s18 + $0x4] sm:$0xf]  ;;  %v1271_v9 = vcombine.low %v1722_v2, %v1722_v2  ;;  %v1736_v10 = vld [vmem:[%s1713_s18 + $0x14] sm:$0xf]  ;;  %v1739_v11 = vld [vmem:[%s1713_s18 + $0x10] sm:$0xf] }
  0x1c   : > { %v1269_v12 = vcombine.low %v1731_v8, %v1731_v8  ;;  %v1272_v13 = vcombine.low %v1739_v11, %v1739_v11  ;;  %v1273_v21 = vcombine.low %v1736_v10, %v1736_v10  ;;  %v1748_v26 = vld [vmem:[%s1713_s18 + $0x18] sm:$0xf]  ;;  %v1751_v30 = vld [vmem:[%s1713_s18 + $0x1c] sm:$0xf]  ;;  %v1249_v55 = vcombine.low %v1600_v3, %v1716_v0  ;;  %s1122_s18 = sshll.u32 %s1927_s11, 4  ;;  %s1958_s18 = int_to_ptr.vmem [resolvable:$true] %s1122_s18 }
  0x1d   : > { %v641_v14 = vshrl.u32 %v1268_v5, 16  ;;  %v644_v15 = vshll.u32 %v1268_v5, 16  ;;  %v655_v16 = vshrl.u32 %v1270_v6, 16  ;;  %v658_v17 = vshll.u32 %v1270_v6, 16  ;;  %v1486_v5 = vld [vmem:[%s2019_s5] sm:$0xff]   ;;  %s1520_s22 = scalar_lea.vmem %s1958_s18, 1024 }
  0x1e   : > { %v648_v18 = vshrl.u32 %v1269_v12, 16  ;;  %v662_v19 = vshrl.u32 %v1271_v9, 16  ;;  %v651_v24 = vshll.u32 %v1269_v12, 16  ;;  %v665_v25 = vshll.u32 %v1271_v9, 16  ;;  %1355 = vmatprep.subr.bf16.mxu0 %v1486_v5  ;;  %p1521_p12 = scmp.ne.s32.totalorder %s1958_s18, %s1520_s22 }
  0x1f   : > { %v643_v22 = vrot.slane %v641_v14, 7  ;;  %v657_v23 = vrot.slane %v655_v16, 7  ;;  %v669_v29 = vshrl.u32 %v1272_v13, 16  ;;  %v676_v35 = vshrl.u32 %v1273_v21, 16 }
  0x20   : > { %v650_v27 = vrot.slane %v648_v18, 7  ;;  %v664_v28 = vrot.slane %v662_v19, 7  ;;  %v672_v36 = vshll.u32 %v1272_v13, 16  ;;  %v1274_v37 = vcombine.low %v1748_v26, %v1748_v26  ;;  %p1522_p13 = pnand %p1521_p12, %p1688_p4 }
  0x21   : > { %v646_v31 = vor.u32 %v644_v15, %v643_v22  ;;  %v660_v32 = vor.u32 %v658_v17, %v657_v23  ;;  %v671_v40 = vrot.slane %v669_v29, 7  ;;  %v1275_v41 = vcombine.low %v1751_v30, %v1751_v30 }
  0x22   : > { %v653_v38 = vor.u32 %v651_v24, %v650_v27  ;;  %v667_v39 = vor.u32 %v665_v25, %v664_v28  ;;  %v683_v42 = vshrl.u32 %v1274_v37, 16  ;;  %v678_v44 = vrot.slane %v676_v35, 7  ;;  %v1487_v28 = vld [vmem:[%s2019_s5 + $0x8] ss:$0 sps:$4 sm:$0xff]   ;;  %p1523_p0 = pneg %p1522_p13 }
  0x23   : > { %731 = vrot.lane.b32.xlu0 %v646_v31, %s1601_s19  ;;  %735 = vrot.lane.b32.xlu1 %v660_v32, %s1601_s19  ;;  %v679_v45 = vshll.u32 %v1273_v21, 16  ;;  %v674_v46 = vor.u32 %v672_v36, %v671_v40  ;;  %v690_v47 = vshrl.u32 %v1275_v41, 16  ;;  %v686_v49 = vshll.u32 %v1274_v37, 16  ;;  %v1313_v36 = vld [vmem:[%s400_s29 + $0x8] sm:$0xff]   ;;  %v1315_v40 = vld [vmem:[%s400_s29 + $0x18] sm:$0xff]  }
  0x24   : > { %v685_v48 = vrot.slane %v683_v42, 7  ;;  %v693_v52 = vshll.u32 %v1275_v41, 16  ;;  %v1251_v56 = vcombine.low %v1722_v2, %v1739_v11  ;;  %v1250_v57 = vcombine.low %v1731_v8, %v1719_v1 }
  0x25   : > { %v681_v50 = vor.u32 %v679_v45, %v678_v44  ;;  %v692_v51 = vrot.slane %v690_v47, 7  ;;  %v1252_v58 = vcombine.low %v1736_v10, %v1748_v26  ;;  %v1258_v60 = vcombine.low %v1716_v0, %v1731_v8  ;;  %v1314_v44 = vld [vmem:[%s400_s29 + $0x10] sm:$0xff]  }
  0x26   : > { %v688_v53 = vor.u32 %v686_v49, %v685_v48  ;;  %v1260_v61 = vcombine.low %v1739_v11, %v1736_v10  ;;  %v1261_v63 = vcombine.low %v1748_v26, %v1751_v30  ;;  %v904_v34 = vsel %vm902_vm4, %v1487_v28, 0 }
  0x27   : > { %733 = vrot.lane.b32.xlu0 %v653_v38, %s1601_s19  ;;  %737 = vrot.lane.b32.xlu1 %v667_v39, %s1601_s19  ;;  %v695_v54 = vor.u32 %v693_v52, %v692_v51  ;;  %v1303_v37 = vunpack.c.l.bf16 %v1313_v36  ;;  %v1311_v42 = vunpack.c.l.bf16 %v1315_v40  ;;  %v1307_v47 = vunpack.c.l.bf16 %v1314_v44 }
  0x28   : > { %v1308_v48 = vunpack.c.h.bf16 %v1314_v44 }
  0x2a   : > { %v1458_v1 = vpack.i.bf16 %v1308_v48, %v1307_v47 }
  0x2b   : > { %771 = vrot.lane.b32.xlu0 %v770_v43, %s1601_s19  ;;  %739 = vrot.lane.b32.xlu1 %v674_v46, %s1601_s19  ;;  %v1312_v43 = vunpack.c.h.bf16 %v1315_v40 }
  0x2f   : > { %741 = vrot.lane.b32.xlu0 %v681_v50, %s1601_s19  ;;  %743 = vrot.lane.b32.xlu1 %v688_v53, %s1601_s19 }
  0x33   : > { %745 = vrot.lane.b32.xlu0 %v695_v54, %s1601_s19  ;;  %444 = vrot.lane.b32.xlu1 %v1249_v55, %s1602_s20 }
  0x37   : > { %448 = vrot.lane.b32.xlu0 %v1251_v56, %s1602_s20  ;;  %446 = vrot.lane.b32.xlu1 %v1250_v57, %s1602_s20 }
  0x3b   : > { %450 = vrot.lane.b32.xlu0 %v1252_v58, %s1602_s20  ;;  %696 = vrot.lane.b32.xlu1 %v646_v31, %s1603_s21 }
  0x3f   : > { %698 = vrot.lane.b32.xlu0 %v653_v38, %s1603_s21  ;;  %700 = vrot.lane.b32.xlu1 %v660_v32, %s1603_s21  ;;  %v1304_v38 = vunpack.c.h.bf16 %v1313_v36 }
  0x41   : > { %v1453_v8 = vpack.i.bf16 %v1304_v38, %v1303_v37 }
  0x43   : > { %702 = vrot.lane.b32.xlu0 %v667_v39, %s1603_s21  ;;  %704 = vrot.lane.b32.xlu1 %v674_v46, %s1603_s21  ;;  %v1298_v39 = vld [vmem:[%s400_s29] sm:$0xff]   ;;  %v1463_v46 = vpack.i.bf16 %v1312_v43, %v1311_v42  ;;  %s1524_s29 = sshll.u32 %s1606_s23, 4  ;;  %s1525_s29 = int_to_ptr.vmem [resolvable:$false] %s1524_s29 }
  0x44   : > { %v1299_v0 = vunpack.c.l.bf16 %v1298_v39  ;;  %v1300_v41 = vunpack.c.h.bf16 %v1298_v39  ;;  %s1526_s14 = scalar_lea.vmem %s1525_s29, 2048  ;;  %p1527_p1 = scmp.lt.s32.totalorder %s1958_s18, %s1525_s29 }
  0x45   : > { %p1528_p2 = scmp.lt.s32.totalorder %s1526_s14, %s1520_s22 }
  0x46   : > { %v1448_v45 = vpack.i.bf16 %v1300_v41, %v1299_v0 }
  0x47   : > { %706 = vrot.lane.b32.xlu0 %v681_v50, %s1603_s21  ;;  %708 = vrot.lane.b32.xlu1 %v688_v53, %s1603_s21  ;;  %p1529_p3 = por %p1528_p2, %p1527_p1 }
  0x49   : > { %p1530_p5 = pnand %p1529_p3, %p1523_p0 }
  0x4b   : > { %710 = vrot.lane.b32.xlu0 %v695_v54, %s1603_s21  ;;  %s1967_s21 = scalar_lea.sflag [#allocation3], %s363_s30 }
  0x95   : > { %v732_v3 = vpop.permute.xlu0 %731  ;;  %v736_v4 = vpop.permute.xlu1 %735 }
  0x96   : > { %v755_v20 = vsel %vm1782_vm2, 0, %v732_v3  ;;  %v757_v23 = vsel %vm1782_vm2, 0, %v736_v4 }
  0x99   : > { %v734_v9 = vpop.permute.xlu0 %733  ;;  %v738_v12 = vpop.permute.xlu1 %737 }
  0x9a   : > { %v756_v13 = vsel %vm1782_vm2, 0, %v734_v9  ;;  %v758_v14 = vsel %vm1782_vm2, 0, %v738_v12 }
  0x9b   : > { %785 = vrot.lane.b32.xlu0 %v756_v13, %s1604_s16 }
  0x9d   : > { %v772_v15 = vpop.permute.xlu0 %771  ;;  %v740_v16 = vpop.permute.xlu1 %739 }
  0x9e   : > { %v774_v17 = vsel %vm1782_vm2, 0, %v772_v15  ;;  %v759_v29 = vsel %vm1782_vm2, 0, %v740_v16 }
  0x9f   : > { %789 = vrot.lane.b32.xlu0 %v758_v14, %s1604_s16  ;;  %800 = vrot.lane.b32.xlu1 %v774_v17, %s1605_s17 }
  0xa1   : > { %v742_v18 = vpop.permute.xlu0 %741  ;;  %v744_v19 = vpop.permute.xlu1 %743 }
  0xa2   : > { %v760_v24 = vsel %vm1782_vm2, 0, %v742_v18  ;;  %v761_v35 = vsel %vm1782_vm2, 0, %v744_v19 }
  0xa3   : > { %802 = vrot.lane.b32.xlu0 %v755_v20, %s1605_s17  ;;  %783 = vrot.lane.b32.xlu1 %v755_v20, %s1604_s16 }
  0xa5   : > { %v746_v21 = vpop.permute.xlu0 %745  ;;  %v445_v22 = vpop.permute.xlu1 %444 }
  0xa6   : > { %1335 = vmatprep.mubr.msk.bf16.mxu0 %vm458_vm3, %v445_v22  ;;  %v762_v31 = vsel %vm1782_vm2, 0, %v746_v21 }
  0xa7   : > { %806 = vrot.lane.b32.xlu0 %v757_v23, %s1605_s17  ;;  %787 = vrot.lane.b32.xlu1 %v757_v23, %s1604_s16 }
  0xa9   : > { %v449_v25 = vpop.permute.xlu0 %448  ;;  %v447_v27 = vpop.permute.xlu1 %446 }
  0xaa   : > { %1339 = vmatprep.mubr.msk.bf16.mxu1 %vm458_vm3, %v449_v25  ;;  %1336 = vmatmul.mubr.msk.bf16.vlgmr.msra.gmra.mrb[0].mxu0 %vm458_vm3, %v447_v27 }
  0xab   : > { %793 = vrot.lane.b32.xlu0 %v760_v24, %s1604_s16  ;;  %804 = vrot.lane.b32.xlu1 %v756_v13, %s1605_s17 }
  0xac   : > { %1356 = vmatpush3.bf16.msra.mxu0 %v1486_v5 }
  0xad   : > { %v451_v32 = vpop.permute.xlu0 %450  ;;  %1385 = vmatprep.subr.msk.bf16.mxu0 %vm902_vm4, %v1487_v28 }
  0xae   : > { %1340 = vmatmul.mubr.msk.bf16.vlgmr.msra.gmra.mrb[0].mxu1 %vm458_vm3, %v451_v32 }
  0xaf   : > { %797 = vrot.lane.b32.xlu0 %v762_v31, %s1604_s16  ;;  %791 = vrot.lane.b32.xlu1 %v759_v29, %s1604_s16 }
  0xb0   : > { %1344 = vmatpush3.bf16.msra.mxu1 %v1774_v62  ;;  %1347 = vmatprep.mubr.msk.bf16.mxu1 %vm554_vm5, %v1258_v60 }
  0xb1   : > { %1345 = vmatprep.subr.bf16.mxu1 %v1482_v33  ;;  %1358 = vmatpush3.bf16.msra.mxu0 %v904_v34  ;;  %v699_v2 = vpop.permute.xlu0 %698 }
  0xb2   : > { %v724_v56 = vsel %vm1782_vm2, 0, %v699_v2 }
  0xb3   : > { %810 = vrot.lane.b32.xlu0 %v759_v29, %s1605_s17  ;;  %795 = vrot.lane.b32.xlu1 %v761_v35, %s1604_s16 }
  0xb4   : > { %1346 = vmatpush3.bf16.msra.mxu1 %v1482_v33 }
  0xb5   : > { %v703_v10 = vpop.permute.xlu0 %702 }
  0xb6   : > { %v726_v4 = vsel %vm1782_vm2, 0, %v703_v10 }
  0xb7   : > { %814 = vrot.lane.b32.xlu0 %v761_v35, %s1605_s17  ;;  %808 = vrot.lane.b32.xlu1 %v758_v14, %s1605_s17 }
  0xb8   : > { %1348 = vmatmul.mubr.msk.bf16.vlgmr.msra.gmra.mrb[4].mxu1 %vm554_vm5, %v1259_v7  ;;  %v697_v7 = vpop.permute.xlu1 %696 }
  0xb9   : > { %1351 = vmatprep.mubr.msk.bf16.mxu1 %vm554_vm5, %v1260_v61  ;;  %v707_v49 = vpop.permute.xlu0 %706  ;;  %v723_v26 = vsel %vm1782_vm2, 0, %v697_v7 }
  0xba   : > { %v728_v22 = vsel %vm1782_vm2, 0, %v707_v49 }
  0xbb   : > { %812 = vrot.lane.b32.xlu1 %v760_v24, %s1605_s17  ;;  %1454 = vrot.lane.b32.xlu0 %v1453_v8, %s1604_s16  ;;  %s1296_s17 = sshll.u32 %s1590_s26, 10 }
  0xbc   : > { %v701_v11 = vpop.permute.xlu1 %700  ;;  %s1953_s20 = scalar_lea.hbm %s2021_s7, %s1296_s17 }
  0xbd   : > { %v711_v51 = vpop.permute.xlu0 %710  ;;  %v725_v5 = vsel %vm1782_vm2, 0, %v701_v11 }
  0xbe   : > { %v730_v33 = vsel %vm1782_vm2, 0, %v711_v51 }
  0xbf   : > { %1449 = vrot.lane.b32.xlu1 %v1448_v45, %s1604_s16  ;;  %1464 = vrot.lane.b32.xlu0 %v1463_v46, %s1604_s16 }
  0xc0   : > { %1352 = vmatmul.mubr.msk.bf16.gmra.mrb[0].mxu1 %vm554_vm5, %v1261_v63  ;;  %v705_v50 = vpop.permute.xlu1 %704 }
  0xc1   : > { %v727_v23 = vsel %vm1782_vm2, 0, %v705_v50  ;;  %v1287_v50 = vld [vmem:[%s2020_s6] ss:$0 sm:$0xff] }
  0xc3   : > { %1459 = vrot.lane.b32.xlu1 %v1458_v1, %s1604_s16 }
  0xc4   : > { %v709_v52 = vpop.permute.xlu1 %708 }
  0xc5   : > { %v729_v34 = vsel %vm1782_vm2, 0, %v709_v52 }
 0x10d   : > { %v786_v53 = vpop.permute.xlu0 %785 }
 0x10e   : > { %v822_v30 = vsel %vm816_vm6, %v724_v56, %v786_v53 }
 0x111   : > { %v790_v54 = vpop.permute.xlu0 %789  ;;  %v801_v55 = vpop.permute.xlu1 %800 }
 0x112   : > { %v828_v9 = vsel %vm816_vm6, %v726_v4, %v790_v54 }
 0x115   : > { %v803_v57 = vpop.permute.xlu0 %802  ;;  %v784_v58 = vpop.permute.xlu1 %783 }
 0x116   : > { %v844_v59 = vsel %vm458_vm3, %v822_v30, %v803_v57  ;;  %v819_v60 = vsel %vm816_vm6, %v723_v26, %v784_v58 }
 0x117   : > { %v842_v61 = vsel %vm458_vm3, %v819_v60, %v801_v55 }
 0x118   : > { %v1277_v62 = vcombine.low %v842_v61, %v844_v59 }
 0x119   : > { %v807_v63 = vpop.permute.xlu0 %806  ;;  %v788_v3 = vpop.permute.xlu1 %787 }
 0x11a   : > { %1359 = vmatprep.mubr.msk.bf16.mxu0 %vm889_vm7, %v1277_v62  ;;  %v825_v12 = vsel %vm816_vm6, %v725_v5, %v788_v3  ;;  %v848_v15 = vsel %vm458_vm3, %v828_v9, %v807_v63 }
 0x11d   : > { %v794_v13 = vpop.permute.xlu0 %793  ;;  %v805_v14 = vpop.permute.xlu1 %804 }
 0x11e   : > { %v846_v16 = vsel %vm458_vm3, %v825_v12, %v805_v14  ;;  %v834_v24 = vsel %vm816_vm6, %v728_v22, %v794_v13 }
 0x11f   : > { %v1278_v17 = vcombine.low %v846_v16, %v848_v15 }
 0x121   : > { %v798_v18 = vpop.permute.xlu0 %797  ;;  %1360 = vmatmul.mubr.msk.bf16.vlgmr.msra.gmra.mrb[4].mxu0 %vm889_vm7, %v1278_v17  ;;  %v792_v19 = vpop.permute.xlu1 %791 }
 0x122   : > { %v831_v25 = vsel %vm816_vm6, %v727_v23, %v792_v19  ;;  %v840_v35 = vsel %vm816_vm6, %v730_v33, %v798_v18 }
 0x125   : > { %v811_v20 = vpop.permute.xlu0 %810  ;;  %v796_v21 = vpop.permute.xlu1 %795 }
 0x126   : > { %v852_v28 = vsel %vm458_vm3, %v834_v24, %v811_v20  ;;  %v837_v36 = vsel %vm816_vm6, %v729_v34, %v796_v21 }
 0x129   : > { %v809_v27 = vpop.permute.xlu1 %808  ;;  %v815_v31 = vpop.permute.xlu0 %814 }
 0x12a   : > { %v850_v29 = vsel %vm458_vm3, %v831_v25, %v809_v27  ;;  %v856_v38 = vsel %vm458_vm3, %v840_v35, %v815_v31 }
 0x12b   : > { %v1279_v32 = vcombine.low %v850_v29, %v852_v28 }
 0x12d   : > { %1363 = vmatprep.mubr.msk.bf16.mxu0 %vm889_vm7, %v1279_v32  ;;  %v813_v37 = vpop.permute.xlu1 %812 }
 0x12e   : > { %v854_v39 = vsel %vm458_vm3, %v837_v36, %v813_v37 }
 0x12f   : > { %v1280_v40 = vcombine.low %v854_v39, %v856_v38 }
 0x131   : > { %1364 = vmatmul.mubr.msk.bf16.gmra.mrb[8].mxu0 %vm889_vm7, %v1280_v40 }
 0x17d   : > { %v1337_v0 = vpop.f32.mrb[0].mxu0 }
 0x17e   : > { %v505_v8 = vpop.f32.mrb[1].mxu0 }
 0x17f   : > { %v1338_v41 = vpop.f32.mrb[2].mxu0 }
 0x180   : > { %v508_v42 = vpop.f32.mrb[3].mxu0 }
 0x18b   : > { %v1349_v6 = vpop.f32.mrb[4].mxu1 }
 0x18c   : > { %v601_v43 = vpop.f32.mrb[5].mxu1  ;;  %v610_v44 = vadd.f32 %v1349_v6, %v1337_v0 }
 0x18d   : > { %v1350_v45 = vpop.f32.mrb[6].mxu1  ;;  %v602_v46 = vadd.f32 %v601_v43, %v505_v8  ;;  %v1455_v8 = vpop.permute.xlu0 %1454 }
 0x18e   : > { %v604_v47 = vpop.f32.mrb[7].mxu1  ;;  %v613_v48 = vadd.f32 %v1350_v45, %v1338_v41  ;;  %v1450_v41 = vpop.permute.xlu1 %1449 }
 0x18f   : > { %v605_v1 = vadd.f32 %v604_v47, %v508_v42  ;;  %v1456_v42 = vunpack.i.l.bf16 %v1455_v8  ;;  %v1451_v43 = vunpack.i.l.bf16 %v1450_v41 }
 0x193   : > { %v1353_v2 = vpop.f32.mrb[0].mxu1 }
 0x194   : > { %v617_v7 = vpop.f32.mrb[1].mxu1 }
 0x195   : > { %v1354_v10 = vpop.f32.mrb[2].mxu1 }
 0x196   : > { %v620_v11 = vpop.f32.mrb[3].mxu1 }
 0x1f4   : > { %v1361_v49 = vpop.f32.mrb[4].mxu0 }
 0x1f5   : > { %v973_v51 = vadd.f32 %v1361_v49, %v610_v44  ;;  %v940_v52 = vpop.f32.mrb[5].mxu0 }
 0x1f6   : > { %v971_v53 = vadd.f32 %v940_v52, %v602_v46  ;;  %v1362_v54 = vpop.f32.mrb[6].mxu0  ;;  %v1457_v46 = vunpack.i.h.bf16 %v1455_v8 }
 0x1f7   : > { %v1895_v55 = vadd.f32 %v1287_v50, %v973_v51  ;;  %v974_v56 = vadd.f32 %v1362_v54, %v613_v48  ;;  %v943_v26 = vpop.f32.mrb[7].mxu0 }
 0x1f8   : > { %v1897_v30 = vadd.f32 %v1287_v50, %v971_v53  ;;  %v972_v57 = vadd.f32 %v943_v26, %v605_v1  ;;  %v1452_v1 = vunpack.i.h.bf16 %v1450_v41 }
 0x1f9   : > { %v996_v58 = vsub.f32 0.0, %v1895_v55  ;;  %v1900_v59 = vadd.f32 %v1287_v50, %v974_v56 }
 0x1fa   : > { %v994_v60 = vsub.f32 0.0, %v1897_v30  ;;  %v1903_v61 = vadd.f32 %v1287_v50, %v972_v57 }
 0x1fb   : > { %v1006_v62 = vmul.f32 1.442695, %v996_v58  ;;  %v997_v63 = vsub.f32 0.0, %v1900_v59  ;;  %v1465_v58 = vpop.permute.xlu0 %1464 }
 0x1fc   : > { %v1002_v3 = vmul.f32 1.442695, %v994_v60  ;;  %v995_v4 = vsub.f32 0.0, %v1903_v61  ;;  %v1466_v60 = vunpack.i.l.bf16 %v1465_v58 }
 0x1fd   : > { %1488 = vpow2.f32 %v1006_v62  ;;  %v1008_v5 = vmul.f32 1.442695, %v997_v63 }
 0x1fe   : > { %1490 = vpow2.f32 %v1002_v3  ;;  %v1004_v9 = vmul.f32 1.442695, %v995_v4  ;;  %v1467_v4 = vunpack.i.h.bf16 %v1465_v58 }
 0x1ff   : > { %1492 = vpow2.f32 %v1008_v5 }
 0x200   : > { %1494 = vpow2.f32 %v1004_v9 }
 0x204   : > { %v1365_v12 = vpop.f32.mrb[8].mxu0 }
 0x205   : > { %v1377_v13 = vadd.f32 %v1365_v12, %v1353_v2  ;;  %v956_v14 = vpop.f32.mrb[9].mxu0 }
 0x206   : > { %v1378_v15 = vadd.f32 %v956_v14, %v617_v7  ;;  %v1366_v16 = vpop.f32.mrb[10].mxu0 }
 0x207   : > { %v1489_v17 = vpop.eup %1488  ;;  %v1907_v18 = vadd.f32 %v1377_v13, %v1287_v50  ;;  %v1379_v19 = vadd.f32 %v1366_v16, %v1354_v10  ;;  %v959_v20 = vpop.f32.mrb[11].mxu0 }
 0x208   : > { %v1491_v21 = vpop.eup %1490  ;;  %v1020_v22 = vadd.f32 1.0, %v1489_v17  ;;  %v1909_v23 = vadd.f32 %v1378_v15, %v1287_v50  ;;  %v1380_v24 = vadd.f32 %v959_v20, %v620_v11 }
 0x209   : > { %v1493_v25 = vpop.eup %1492  ;;  %v1018_v27 = vadd.f32 1.0, %v1491_v21  ;;  %v1000_v28 = vsub.f32 0.0, %v1907_v18  ;;  %v1912_v29 = vadd.f32 %v1379_v19, %v1287_v50 }
 0x20a   : > { %v1495_v31 = vpop.eup %1494  ;;  %1496 = vrcp.f32 %v1020_v22  ;;  %v1021_v32 = vadd.f32 1.0, %v1493_v25  ;;  %v998_v33 = vsub.f32 0.0, %v1909_v23  ;;  %v1915_v34 = vadd.f32 %v1380_v24, %v1287_v50 }
 0x20b   : > { %1498 = vrcp.f32 %v1018_v27  ;;  %v1019_v35 = vadd.f32 1.0, %v1495_v31  ;;  %v1014_v36 = vmul.f32 1.442695, %v1000_v28  ;;  %v1001_v37 = vsub.f32 0.0, %v1912_v29 }
 0x20c   : > { %1500 = vrcp.f32 %v1021_v32  ;;  %v1010_v38 = vmul.f32 1.442695, %v998_v33  ;;  %v999_v39 = vsub.f32 0.0, %v1915_v34 }
 0x20d   : > { %1502 = vrcp.f32 %v1019_v35  ;;  %v1016_v40 = vmul.f32 1.442695, %v1001_v37 }
 0x20e   : > { %1504 = vpow2.f32 %v1014_v36  ;;  %v1012_v0 = vmul.f32 1.442695, %v999_v39 }
 0x20f   : > { %1506 = vpow2.f32 %v1010_v38 }
 0x210   : > { %1508 = vpow2.f32 %v1016_v40 }
 0x211   : > { %1510 = vpow2.f32 %v1012_v0 }
 0x214   : > { %v1497_v6 = vpop.eup %1496 }
 0x215   : > { %v1499_v44 = vpop.eup %1498  ;;  %v1036_v45 = vmul.f32 %v1497_v6, %v1895_v55 }
 0x216   : > { %v1501_v47 = vpop.eup %1500  ;;  %v1034_v48 = vmul.f32 %v1499_v44, %v1897_v30 }
 0x217   : > { %v1503_v2 = vpop.eup %1502  ;;  %v1037_v7 = vmul.f32 %v1501_v47, %v1900_v59  ;;  %v1092_v10 = vsel %vm816_vm6, %v1036_v45, %v1456_v42  ;;  %v1460_v59 = vpop.permute.xlu1 %1459 }
 0x218   : > { %v1505_v11 = vpop.eup %1504  ;;  %v1035_v49 = vmul.f32 %v1503_v2, %v1903_v61  ;;  %1100 = vst.msk [vmem:[%s1927_s11 + $0x10] sm:$0xff] %vm458_vm3, %v1092_v10  ;;  %v1090_v50 = vsel %vm816_vm6, %v1034_v48, %v1451_v43  ;;  %v1461_v62 = vunpack.i.l.bf16 %v1460_v59  ;;  %v1462_v12 = vunpack.i.h.bf16 %v1460_v59 }
 0x219   : > { %v1507_v51 = vpop.eup %1506  ;;  %v1024_v52 = vadd.f32 1.0, %v1505_v11  ;;  %v1093_v53 = vsel %vm816_vm6, %v1037_v7, %v1457_v46  ;;  %1098 = vst.msk [vmem:[%s1927_s11] sm:$0xff] %vm458_vm3, %v1090_v50 }
 0x21a   : > { %v1509_v54 = vpop.eup %1508  ;;  %v1022_v55 = vadd.f32 1.0, %v1507_v51  ;;  %1101 = vst.msk [vmem:[%s1927_s11 + $0x18] sm:$0xff] %vm458_vm3, %v1093_v53  ;;  %v1091_v56 = vsel %vm816_vm6, %v1035_v49, %v1452_v1 }
 0x21b   : > { %v1511_v26 = vpop.eup %1510  ;;  %1512 = vrcp.f32 %v1024_v52  ;;  %v1025_v30 = vadd.f32 1.0, %v1509_v54  ;;  %1099 = vst.msk [vmem:[%s1927_s11 + $0x8] sm:$0xff] %vm458_vm3, %v1091_v56 }
 0x21c   : > { %1514 = vrcp.f32 %v1022_v55  ;;  %v1023_v57 = vadd.f32 1.0, %v1511_v26 }
 0x21d   : > { %1516 = vrcp.f32 %v1025_v30 }
 0x21e   : > { %1518 = vrcp.f32 %v1023_v57 }
 0x225   : > { %v1513_v61 = vpop.eup %1512 }
 0x226   : > { %v1515_v63 = vpop.eup %1514  ;;  %v1040_v3 = vmul.f32 %v1513_v61, %v1907_v18 }
 0x227   : > { %v1517_v5 = vpop.eup %1516  ;;  %v1038_v9 = vmul.f32 %v1515_v63, %v1909_v23 }
 0x228   : > { %v1519_v13 = vpop.eup %1518  ;;  %v1041_v14 = vmul.f32 %v1517_v5, %v1912_v29  ;;  %v1096_v15 = vsel %vm816_vm6, %v1040_v3, %v1466_v60 }
 0x229   : > { %v1039_v16 = vmul.f32 %v1519_v13, %v1915_v34  ;;  %1104 = vst.msk [vmem:[%s1927_s11 + $0x30] sm:$0xff] %vm458_vm3, %v1096_v15  ;;  %v1094_v17 = vsel %vm816_vm6, %v1038_v9, %v1461_v62 }
 0x22a   : > { %v1097_v18 = vsel %vm816_vm6, %v1041_v14, %v1467_v4  ;;  %1102 = vst.msk [vmem:[%s1927_s11 + $0x20] sm:$0xff] %vm458_vm3, %v1094_v17 }
 0x22b   : > { %1105 = vst.msk [vmem:[%s1927_s11 + $0x38] sm:$0xff] %vm458_vm3, %v1097_v18  ;;  %v1095_v19 = vsel %vm816_vm6, %v1039_v16, %v1462_v12 }
 0x22c   : > { %1103 = vst.msk [vmem:[%s1927_s11 + $0x28] sm:$0xff] %vm458_vm3, %v1095_v19 }
 0x22d   : > { %1533 = shalt.err (!%p1530_p5)
}
 0x22e   : > { %s1534_s15 = scalar_lea.hbm %s1953_s20, 1024  ;;  %s1538_s11 = scalar_lea.hbm %s2021_s7, 2048 }
 0x22f   : > { %p1535_p6 = scmp.ne.s32.totalorder %s1953_s20, %s1534_s15  ;;  %p1539_p10 = scmp.lt.u32.totalorder %s1953_s20, %s2021_s7 }
 0x230   : > { %p1540_p11 = scmp.lt.u32.totalorder %s1538_s11, %s1534_s15  ;;  %p1542_p13 = scmp.lt.u32.totalorder %s1534_s15, %s1953_s20 }
 0x231   : > { %p1536_p7 = pnand %p1535_p6, %p1688_p4 }
 0x232   : > { %p1541_p12 = por %p1540_p11, %p1539_p10 }
 0x233   : > { %p1537_p9 = pneg %p1536_p7 }
 0x234   : > { %p1543_p0 = por %p1542_p13, %p1541_p12 }
 0x236   : > { %p1544_p1 = pnand %p1543_p0, %p1537_p9 }
 0x238   : > { %1547 = shalt.err (!%p1544_p1)
}
 0x239   : > { %s1607_s19 = smov 128  }
 0x23a   : > { %1386 = dma.vmem_to_hbm [thread:$0]  (%p1688_p4), %s1958_s18, 1024, %s1953_s20, %s1967_s21, %s1607_s19, %s1607_s19, %s1604_s16  }
 0x23b PF: > { %p1392_p2 = scmp.ge.s32.totalorder %s1598_s28, 2  ;;  %s1137_s22 = sand.u32 1, %s1578_s1  }
 0x23c   : > { %s1138_s23 = scalar_lea.sflag [#allocation3], %s1137_s22 }
 0x23d   : > { %p1389_p3 = pnand %p1392_p2, %p1695_p8 }
 0x23f   : > { %1573 = dma.done.wait (!%p1389_p3), %s1138_s23, 1024  }
 0x240   : > { %1575 = vsyncadd (!%p1389_p3), %s1138_s23, 4294966272  ;;  %s20_s28 = sadd.s32 1, %s1598_s28   ;;  %s2026_s1 = smov %s1582_s24 }
 0x241   : > { %p17_p5 = scmp.ge.s32.totalorder %s20_s28, 4   ;;  %s2027_s24 = smov %s1586_s25 }
 0x242   : > { %s2028_s25 = smov %s1701_s13  ;;  %s2029_s26 = smov %s1594_s27 }
 0x243   : > { %s2030_s27 = smov %s2032_s8  ;;  %19 = sbr.rel (!%p17_p5) target bundleno = 4 (0x4), region = 89 }
 0x24a   :  { %1143 = vsyncpa [#allocation3], 1 }
 0x24b   :  { %1145 = vsyncpa [#allocation3 + $0x1], 1 }

</bundles_post_ra>
